<compile_context>
chip_gen: v7x
topology: tpu7x:2x2x1
jax: 0.10.0
libtpu: 0.0.40
codegen_flags: <defaults>
</compile_context>

<pallas_src>
import functools
import math

import jax
import jax.numpy as jnp
from jax.experimental import pallas as pl
from jax.experimental.pallas import tpu as pltpu


# ----------------------------------------------------------------------------
# Pallas kernel: grouped matmul   out[g] = act(W[g] @ A[g] + b[g])
#   W   : (G, Cout, Kd)  f32   (per-group weights; grid-indexed block)
#   A   : (G, Kd, M)     f32   (im2col patches / deform columns, M = B*OH*OW)
#   b   : (G, Cout, 1)   f32
#   out : (G, Cout, M)   f32   (lane-dense: M on the 128-lane axis)
# Grid is (G,) and marked "parallel" (v7x: both TensorCores; G=1 elsewhere).
# ----------------------------------------------------------------------------
@functools.lru_cache(maxsize=None)
def _build_gmm(G, Cout, Kd, M, has_bias, act):
    def kernel(*refs):
        if has_bias:
            w_ref, a_ref, b_ref, o_ref = refs
        else:
            w_ref, a_ref, o_ref = refs
        acc = jnp.dot(w_ref[0], a_ref[0], preferred_element_type=jnp.float32)
        if has_bias:
            acc = acc + b_ref[0]
        if act:
            acc = jnp.maximum(acc, 0.2 * acc)   # LeakyReLU(0.2): single vmax
        o_ref[0] = acc

    in_specs = [
        pl.BlockSpec((1, Cout, Kd), lambda g: (g, 0, 0)),   # per-group weights
        pl.BlockSpec((1, Kd, M), lambda g: (g, 0, 0)),      # per-group patches
    ]
    if has_bias:
        in_specs.append(pl.BlockSpec((1, Cout, 1), lambda g: (g, 0, 0)))

    return pl.pallas_call(
        kernel,
        out_shape=jax.ShapeDtypeStruct((G, Cout, M), jnp.float32),
        grid=(G,),
        in_specs=in_specs,
        out_specs=pl.BlockSpec((1, Cout, M), lambda g: (g, 0, 0)),
        compiler_params=pltpu.CompilerParams(dimension_semantics=("parallel",)),
    )


# ----------------------------------------------------------------------------
# Conv2d = pad + im2col (XLA glue, fused inside the surrounding block jit)
#          + Pallas grouped matmul (hot path).  Channel-first activations.
#   x : (G, Cin, B, H, W)     w : (G, K, K, Cin, Cout)     b : (G, Cout)|None
# ----------------------------------------------------------------------------
@functools.lru_cache(maxsize=None)
def _build_conv(G, Cin, B, H, W, Cout, K, stride, pad, has_bias, act):
    OH = (H + 2 * pad - K) // stride + 1
    OW = (W + 2 * pad - K) // stride + 1
    M = B * OH * OW
    Kd = K * K * Cin
    mm = _build_gmm(G, Cout, Kd, M, has_bias, act)

    def fn(x, w, b=None):
        xp = jnp.pad(x, ((0, 0), (0, 0), (0, 0), (pad, pad), (pad, pad)))
        taps = []
        for kh in range(K):
            for kw in range(K):
                taps.append(
                    jax.lax.slice(
                        xp,
                        (0, 0, 0, kh, kw),
                        (G, Cin, B,
                         kh + (OH - 1) * stride + 1,
                         kw + (OW - 1) * stride + 1),
                        (1, 1, 1, stride, stride),
                    )
                )
        # (G, KK, Cin, B, OH, OW) -> (G, Kd, M); Kd order = (kh, kw, cin)
        patches = jnp.stack(taps, axis=1).reshape(G, Kd, M)
        # weights (G, K, K, Cin, Cout) -> (G, Cout, Kd), same (kh, kw, cin) order
        wmat = jnp.transpose(w.reshape(G, Kd, Cout), (0, 2, 1))
        if has_bias:
            out = mm(wmat, patches, b.reshape(G, Cout, 1))
        else:
            out = mm(wmat, patches)
        return out.reshape(G, Cout, B, OH, OW)

    return fn


def conv2d(x, p, *, stride=1, pad=0, act=False):
    G, Cin, B, H, W = x.shape
    K = p["w"].shape[1]
    Cout = p["w"].shape[-1]
    has_bias = p["b"] is not None
    fn = _build_conv(G, Cin, B, H, W, Cout, K, stride, pad, has_bias, act)
    return fn(x, p["w"], p["b"]) if has_bias else fn(x, p["w"])


# ----------------------------------------------------------------------------
# Modulated deformable conv (DCNv2, deformable_groups == in_channels).
# Bilinear sampling is gather-free (separable weighted one-hot matmuls, f32);
# the matmul runs through the same lane-dense grouped Pallas kernel.
# ----------------------------------------------------------------------------
@functools.lru_cache(maxsize=None)
def _build_deform(G, Cin, B, H, W, Cout, ks, pad, has_bias, act):
    KK = ks * ks
    Kd = Cin * KK
    M = B * H * W
    mm = _build_gmm(G, Cout, Kd, M, has_bias, act)

    def axis_weights(s, L):
        # 1-D linear interpolation weights as a weighted one-hot over [0, L)
        # (zero-padding semantics outside the image).
        f0 = jnp.floor(s)
        frac = s - f0
        idx = jnp.arange(L, dtype=jnp.float32)

        def tap(fi, wt):
            return (fi[..., None] == idx).astype(jnp.float32) * wt[..., None]

        return tap(f0, 1.0 - frac) + tap(f0 + 1.0, frac)

    def fn(x, off, msk, w, b=None):
        # TODO(synk): ModulatedDeformConv is not defined in the source module;
        # mmcv-style DCNv2 semantics are assumed: offset channels per
        # deformable group (== Cin) ordered (kk, [dy, dx]), then all masks.
        off = off.reshape(G, Cin, KK, 2, B, H, W)
        msk = msk.reshape(G, Cin, KK, B, H, W)
        ky, kx = jnp.meshgrid(jnp.arange(ks, dtype=jnp.float32),
                              jnp.arange(ks, dtype=jnp.float32), indexing="ij")
        ky = ky.reshape(KK) - pad
        kx = kx.reshape(KK) - pad
        base_y = jnp.arange(H, dtype=jnp.float32)[None, :] + ky[:, None]  # (KK,H)
        base_x = jnp.arange(W, dtype=jnp.float32)[None, :] + kx[:, None]  # (KK,W)
        sy = base_y[None, None, :, None, :, None] + off[:, :, :, 0]  # (G,C,KK,B,H,W)
        sx = base_x[None, None, :, None, None, :] + off[:, :, :, 1]

        ay = axis_weights(sy, H)                        # (G,C,KK,B,H,W,H')
        bx = axis_weights(sx, W)                        # (G,C,KK,B,H,W,W')
        rows = jnp.einsum('gckbyxh,gcbhw->gckbyxw', ay, x)
        sampled = (rows * bx).sum(-1) * msk             # (G,C,KK,B,H,W)

        cols = sampled.reshape(G, Kd, M)                # Kd order = (cin, kh, kw)
        wmat = jnp.transpose(w, (0, 4, 3, 1, 2)).reshape(G, Cout, Kd)
        if has_bias:
            out = mm(wmat, cols, b.reshape(G, Cout, 1))
        else:
            out = mm(wmat, cols)
        return out.reshape(G, Cout, B, H, W)

    return fn


def modulated_deform_conv(x, off, msk, p, ks, pad, act):
    G, Cin, B, H, W = x.shape
    Cout = p["w"].shape[-1]
    has_bias = p["b"] is not None
    fn = _build_deform(G, Cin, B, H, W, Cout, ks, pad, has_bias, act)
    return fn(x, off, msk, p["w"], p["b"]) if has_bias else fn(x, off, msk, p["w"])


def upsample2x(x):
    # bilinear, scale 2, align_corners=False (PyTorch semantics); spatial dims
    # are the last two axes (channel-first layout).
    h, w = x.shape[-2], x.shape[-1]
    sy = jnp.maximum((jnp.arange(2 * h, dtype=jnp.float32) + 0.5) * 0.5 - 0.5, 0.0)
    sx = jnp.maximum((jnp.arange(2 * w, dtype=jnp.float32) + 0.5) * 0.5 - 0.5, 0.0)
    y0 = jnp.floor(sy).astype(jnp.int32)
    x0 = jnp.floor(sx).astype(jnp.int32)
    y1 = jnp.minimum(y0 + 1, h - 1)
    x1 = jnp.minimum(x0 + 1, w - 1)
    wy = (sy - y0.astype(jnp.float32))[:, None]          # (2h, 1)
    wx = sx - x0.astype(jnp.float32)                     # (2w,)
    rows = jnp.take(x, y0, axis=-2) * (1.0 - wy) + jnp.take(x, y1, axis=-2) * wy
    return jnp.take(rows, x0, axis=-1) * (1.0 - wx) + jnp.take(rows, x1, axis=-1) * wx


# ----------------------------------------------------------------------------
# Parameter init (deterministic, synthetic weights).  All weights carry a
# leading group axis G (G=4 for the four PPDFM branches, else G=1).
# ----------------------------------------------------------------------------
class KeyGen:
    def __init__(self, seed):
        self.key = jax.random.PRNGKey(seed)

    def __call__(self):
        self.key, sub = jax.random.split(self.key)
        return sub


_SCALE = 0.1


def init_conv(kg, cin, cout, k, bias=False, groups=1):
    bound = _SCALE / math.sqrt(cin * k * k)
    w = jax.random.uniform(kg(), (groups, k, k, cin, cout), jnp.float32, -bound, bound)
    b = jax.random.uniform(kg(), (groups, cout), jnp.float32, -bound, bound) if bias else None
    return {"w": w, "b": b}


def init_rb(kg, ch, g=1):
    return {"conv01": init_conv(kg, ch, ch, 3, groups=g),
            "conv02": init_conv(kg, ch, ch, 3, groups=g)}


def init_fe(kg, C, F):
    return {"conv0": init_conv(kg, C, F, 5), "rb": [init_rb(kg, F) for _ in range(3)]}


def init_rdb(kg, cin, growth, k, g=1, num_layer=3):
    layers, c = [], cin
    for _ in range(num_layer):
        layers.append(init_conv(kg, c, growth, k, groups=g))
        c += growth
    return {"dense": layers, "conv1x1": init_conv(kg, c, cin, 1, groups=g)}


def init_igf(kg, C, F):
    return {
        "convs": [init_conv(kg, F, F, 3) for _ in range(2)],
        "masks": [init_conv(kg, F, 1, 3) for _ in range(2)],
        "merge_conv": init_conv(kg, 2 * F, F, 3),
        "rdb_out": [init_rdb(kg, F, F, 3) for _ in range(4)],
        "out": init_conv(kg, F, F, 3, bias=True),
    }


def init_pdfb(kg, C, F, g, dk=3):
    dg, KK = 3 * C, dk * dk
    return {
        "conv_l1": init_conv(kg, F, C, 3, groups=g),
        "conv_l2_1": init_conv(kg, C, C, 3, groups=g),
        "conv_l2_2": init_conv(kg, C, C, 3, groups=g),
        "conv_l3_1": init_conv(kg, C, C, 3, groups=g),
        "conv_l3_2": init_conv(kg, C, C, 3, groups=g),
        "cat_off": init_conv(kg, 3 * C, F, 3, groups=g),
        "rb_off": [init_rb(kg, F, g) for _ in range(3)],
        "offset_mask": init_conv(kg, F, dg * 3 * KK, 3, bias=True, groups=g),
        "deform_conv": init_conv(kg, dg, F, dk, bias=True, groups=g),
        "off_msk_conv": init_conv(kg, 2 * dg * 3 * KK, dg * 3 * KK, 3, bias=True, groups=g),
        "fused_feat_conv": init_conv(kg, 2 * F, F, 3, bias=True, groups=g),
    }


def init_ppdfb(kg, C, F, g):
    return {"conv0": init_conv(kg, F, F, 3, groups=g),
            "pdfb": init_pdfb(kg, C, F, g),
            "merge": init_conv(kg, 2 * F, F, 1, groups=g),
            "rdb": init_rdb(kg, F, F, 3, g)}


def init_ppdfm(kg, C, F, g):
    return {"ppdfb": init_ppdfb(kg, C, F, g), "pdfb": init_pdfb(kg, C, F, g)}


def init_pfnet(kg, C, F):
    return {
        "feat_ext": init_fe(kg, C, F),
        "ppdfm": init_ppdfm(kg, C, F, g=4),   # all 4 branches, group-batched
        "merge": init_igf(kg, C, F),
        "out": init_conv(kg, F, 1, 3, bias=True),
    }


# ----------------------------------------------------------------------------
# Module forward passes.  Activations are (G, C, B, H, W); views are folded
# into B; the 4 PPDFM branches ride the G (grid-parallel) axis.
# ----------------------------------------------------------------------------
def rb_fwd(p, x):
    buf = conv2d(x, p["conv01"], pad=1, act=True)
    buf = conv2d(buf, p["conv02"], pad=1)
    return buf + x


def rdb_fwd(p, x):
    out = x
    for lp in p["dense"]:
        new = conv2d(out, lp, pad=1, act=True)
        out = jnp.concatenate([out, new], axis=1)
    out = conv2d(out, p["conv1x1"], pad=0)
    return out + x


@jax.jit
def fe_fwd(p, x):
    # x: (1, C, 12N, H, W) -- all 4 groups x 3 views folded into B (shared weights)
    o = conv2d(x, p["conv0"], pad=2, act=True)
    for rbp in p["rb"]:
        o = rb_fwd(rbp, o)
    return o


@jax.jit
def igf_fwd(p, xs):
    feats, masks = [], []
    for i in range(2):
        f = conv2d(xs[i], p["convs"][i], pad=1, act=True)
        m = conv2d(f, p["masks"][i], pad=1)
        feats.append(f)
        masks.append(m)
    mstack = jnp.stack(masks, axis=0)                 # (2, 1, 1, N, H, W)
    sm = jax.nn.softmax(mstack, axis=0)
    merged = jnp.concatenate([feats[0] * sm[0], feats[1] * sm[1]], axis=1)
    out0 = conv2d(merged, p["merge_conv"], pad=1, act=True)
    out1 = out0
    for rp in p["rdb_out"]:
        out1 = rdb_fwd(rp, out1)
    return conv2d(out1, p["out"], pad=1, act=True)


@jax.jit
def tail_fwd(p_out, merged, x_center_cf):
    res = conv2d(merged, p_out, pad=1, act=True)      # (1, 1, N, H, W)
    return res + x_center_cf                          # broadcast over channels


@functools.partial(jax.jit, static_argnums=(2,))
def pdfb_fwd(p, x, C):
    # x: (G, F, 3N, H, W), views on the B axis (v-major)
    dk = 3
    dg, KK = 3 * C, dk * dk
    n_off = dg * 2 * KK

    f1 = conv2d(x, p["conv_l1"], pad=1, act=True)
    f2 = conv2d(f1, p["conv_l2_1"], stride=2, pad=1, act=True)
    f2 = conv2d(f2, p["conv_l2_2"], pad=1, act=True)
    f3 = conv2d(f2, p["conv_l3_1"], stride=2, pad=1, act=True)
    f3 = conv2d(f3, p["conv_l3_2"], pad=1, act=True)

    def views_to_channels(f):
        g, c, b, h, w = f.shape
        return jnp.transpose(f.reshape(g, c, 3, b // 3, h, w),
                             (0, 2, 1, 3, 4, 5)).reshape(g, 3 * c, b // 3, h, w)

    cat_feats = [views_to_channels(f1), views_to_channels(f2), views_to_channels(f3)]

    upsampled_off_mask = upsampled_fused_feat = fused_feat = None
    for i in range(3, 0, -1):
        cf = cat_feats[i - 1]
        off_feat = conv2d(cf, p["cat_off"], pad=1)
        for rbp in p["rb_off"]:
            off_feat = rb_fwd(rbp, off_feat)
        off_msk = conv2d(off_feat, p["offset_mask"], pad=1)
        if i < 3:
            off_msk = conv2d(jnp.concatenate([off_msk, upsampled_off_mask], axis=1),
                             p["off_msk_conv"], pad=1)
        off = off_msk[:, :n_off]
        msk = jax.nn.sigmoid(off_msk[:, n_off:])
        fused_feat = modulated_deform_conv(cf, off, msk, p["deform_conv"],
                                           dk, dk // 2, act=True)
        if i < 3:
            fused_feat = conv2d(jnp.concatenate([fused_feat, upsampled_fused_feat], axis=1),
                                p["fused_feat_conv"], pad=1)
        if i > 1:
            upsampled_off_mask = upsample2x(off_msk) * 2.0
            upsampled_fused_feat = upsample2x(fused_feat)
    return fused_feat


@functools.partial(jax.jit, static_argnums=(2,))
def ppdfb_fwd(p, x, C):
    # x: (G, F, 3N, H, W)
    N = x.shape[2] // 3
    spa = conv2d(x, p["conv0"], pad=1, act=True)
    fused = pdfb_fwd(p["pdfb"], spa, C)               # (G, F, N, H, W)
    fused3 = jnp.concatenate([fused, fused, fused], axis=2)   # views share fused
    r = conv2d(jnp.concatenate([fused3, spa], axis=1), p["merge"], pad=0, act=True)
    r = rdb_fwd(p["rdb"], r)
    del N
    return r + x


def ppdfm_fwd(p, x, C):
    for _ in range(3):
        x = ppdfb_fwd(p["ppdfb"], x, C)
    return pdfb_fwd(p["pdfb"], x, C)


def pfnet_fwd(params, x, C):
    # x: (N, 9, C, H, W)   (PyTorch layout)
    N, an2, _, H, W = x.shape
    groups = [[3, 4, 5], [1, 4, 7], [0, 4, 8], [2, 4, 6]]

    xv = jnp.transpose(x, (1, 2, 0, 3, 4))             # (9, C, N, H, W)
    x_center_cf = xv[4][None]                          # (1, C, N, H, W)

    # Shared feature extractor: 4 groups x 3 views in one batched call (B=(g,v,n)).
    fe_in = jnp.stack([xv[j] for g in groups for j in g], axis=0)   # (12, C, N, H, W)
    fe_in = jnp.transpose(fe_in, (1, 0, 2, 3, 4)).reshape(1, C, 12 * N, H, W)
    feats = fe_fwd(params["feat_ext"], fe_in)          # (1, F, 12N, H, W)
    Fch = feats.shape[1]

    # -> (4, F, 3N, H, W): group on the grid-parallel G axis, views in B.
    feats_g = jnp.transpose(feats[0].reshape(Fch, 4, 3 * N, H, W), (1, 0, 2, 3, 4))

    fused_all = ppdfm_fwd(params["ppdfm"], feats_g, C)  # (4, F, N, H, W)
    fused = [fused_all[g:g + 1] for g in range(4)]

    outs = []
    merged_prev = None
    for k in range(4):
        pair = [fused[0], fused[0]] if k == 0 else [merged_prev, fused[k]]
        merged = igf_fwd(params["merge"], pair)
        outs.append(tail_fwd(params["out"], merged, x_center_cf))
        merged_prev = merged
    out_avg = (outs[0] + outs[1] + outs[2] + outs[3]) / 4.0
    outs = outs + [out_avg]
    # (1, C, N, H, W) -> (N, C, H, W)
    return [jnp.transpose(o[0], (1, 0, 2, 3)) for o in outs]


# ----------------------------------------------------------------------------
if __name__ == "__main__":
    num_colors, num_features = 1, 8
    N, H, W = 1, 16, 16

    kg = KeyGen(42)
    params = init_pfnet(kg, num_colors, num_features)

    x = jax.random.normal(jax.random.PRNGKey(0), (N, 9, num_colors, H, W),
                          dtype=jnp.float32)

    outs = pfnet_fwd(params, x, num_colors)
    outs = jax.block_until_ready(outs)

    assert len(outs) == 5
    for o in outs:
        assert o.shape == (N, num_colors, H, W)
        assert bool(jnp.all(jnp.isfinite(o)))
    print("KERNEL_OK")
</pallas_src>

<mosaic_0001>
module attributes {stable_mosaic.version = 11 : i64} {
  func.func @kernel(%arg0: i32, %arg1: memref<1x8x25xf32, #tpu.memory_space<vmem>>, %arg2: memref<1x25x3072xf32, #tpu.memory_space<vmem>>, %arg3: memref<1x8x3072xf32, #tpu.memory_space<vmem>>) attributes {dimension_semantics = [#tpu.dimension_semantics<parallel>], iteration_bounds = array<i64: 1>, scalar_prefetch = 0 : i64, scratch_operands = 0 : i64, tpu.core_type = #tpu.core_type<tc>, window_params = [{transform_indices = @transform_0, window_bounds = array<i64: 1, 8, 25>}, {transform_indices = @transform_1, window_bounds = array<i64: 1, 25, 3072>}, {transform_indices = @transform_2, window_bounds = array<i64: 1, 8, 3072>}]} {
    %c0 = arith.constant 0 : index
    %c0_0 = arith.constant 0 : index
    %c0_1 = arith.constant 0 : index
    %0 = vector.load %arg1[%c0, %c0_0, %c0_1] : memref<1x8x25xf32, #tpu.memory_space<vmem>>, vector<1x8x25xf32>
    %1 = vector.shape_cast %0 : vector<1x8x25xf32> to vector<8x25xf32>
    %c0_2 = arith.constant 0 : index
    %c0_3 = arith.constant 0 : index
    %c0_4 = arith.constant 0 : index
    %2 = vector.load %arg2[%c0_2, %c0_3, %c0_4] : memref<1x25x3072xf32, #tpu.memory_space<vmem>>, vector<1x25x3072xf32>
    %3 = vector.shape_cast %2 : vector<1x25x3072xf32> to vector<25x3072xf32>
    %cst = arith.constant dense<0.000000e+00> : vector<8x3072xf32>
    %4 = tpu.matmul %1, %3, %cst {dimension_numbers = #tpu.dot_dimension_numbers<[1], [0], [0], [1], [0, 0, 1, 1], [], []>} : vector<8x25xf32>, vector<25x3072xf32>, vector<8x3072xf32> -> vector<8x3072xf32>
    %cst_5 = arith.constant 2.000000e-01 : f32
    %5 = vector.broadcast %cst_5 : f32 to vector<8x3072xf32>
    %6 = arith.mulf %5, %4 : vector<8x3072xf32>
    %7 = arith.maximumf %4, %6 : vector<8x3072xf32>
    %c0_6 = arith.constant 0 : index
    %c0_7 = arith.constant 0 : index
    %c0_8 = arith.constant 0 : index
    %8 = vector.load %arg3[%c0_6, %c0_7, %c0_8] : memref<1x8x3072xf32, #tpu.memory_space<vmem>>, vector<1x8x3072xf32>
    %9 = vector.shape_cast %8 : vector<1x8x3072xf32> to vector<8x3072xf32>
    %10 = vector.shape_cast %7 : vector<8x3072xf32> to vector<1x8x3072xf32>
    tpu.vector_store %arg3[%c0_6, %c0_7, %c0_8], %10 {strides = array<i32>} : memref<1x8x3072xf32, #tpu.memory_space<vmem>>, vector<1x8x3072xf32>,
    return
  }
  func.func @transform_0(%arg0: i32) -> (i32, i32, i32) {
    %c0_i32 = arith.constant 0 : i32
    %c0_i32_0 = arith.constant 0 : i32
    %c0_i32_1 = arith.constant 0 : i32
    return %arg0, %c0_i32, %c0_i32_0 : i32, i32, i32
  }
  func.func @transform_1(%arg0: i32) -> (i32, i32, i32) {
    %c0_i32 = arith.constant 0 : i32
    %c0_i32_0 = arith.constant 0 : i32
    %c0_i32_1 = arith.constant 0 : i32
    return %arg0, %c0_i32, %c0_i32_0 : i32, i32, i32
  }
  func.func @transform_2(%arg0: i32) -> (i32, i32, i32) {
    %c0_i32 = arith.constant 0 : i32
    %c0_i32_0 = arith.constant 0 : i32
    %c0_i32_1 = arith.constant 0 : i32
    return %arg0, %c0_i32, %c0_i32_0 : i32, i32, i32
  }
}

module attributes {stable_mosaic.version = 11 : i64} {
  func.func @kernel(%arg0: i32, %arg1: memref<1x8x72xf32, #tpu.memory_space<vmem>>, %arg2: memref<1x72x3072xf32, #tpu.memory_space<vmem>>, %arg3: memref<1x8x3072xf32, #tpu.memory_space<vmem>>) attributes {dimension_semantics = [#tpu.dimension_semantics<parallel>], iteration_bounds = array<i64: 1>, scalar_prefetch = 0 : i64, scratch_operands = 0 : i64, tpu.core_type = #tpu.core_type<tc>, window_params = [{transform_indices = @transform_0, window_bounds = array<i64: 1, 8, 72>}, {transform_indices = @transform_1, window_bounds = array<i64: 1, 72, 3072>}, {transform_indices = @transform_2, window_bounds = array<i64: 1, 8, 3072>}]} {
    %c0 = arith.constant 0 : index
    %c0_0 = arith.constant 0 : index
    %c0_1 = arith.constant 0 : index
    %0 = vector.load %arg1[%c0, %c0_0, %c0_1] : memref<1x8x72xf32, #tpu.memory_space<vmem>>, vector<1x8x72xf32>
    %1 = vector.shape_cast %0 : vector<1x8x72xf32> to vector<8x72xf32>
    %c0_2 = arith.constant 0 : index
    %c0_3 = arith.constant 0 : index
    %c0_4 = arith.constant 0 : index
    %2 = vector.load %arg2[%c0_2, %c0_3, %c0_4] : memref<1x72x3072xf32, #tpu.memory_space<vmem>>, vector<1x72x3072xf32>
    %3 = vector.shape_cast %2 : vector<1x72x3072xf32> to vector<72x3072xf32>
    %cst = arith.constant dense<0.000000e+00> : vector<8x3072xf32>
    %4 = tpu.matmul %1, %3, %cst {dimension_numbers = #tpu.dot_dimension_numbers<[1], [0], [0], [1], [0, 0, 1, 1], [], []>} : vector<8x72xf32>, vector<72x3072xf32>, vector<8x3072xf32> -> vector<8x3072xf32>
    %cst_5 = arith.constant 2.000000e-01 : f32
    %5 = vector.broadcast %cst_5 : f32 to vector<8x3072xf32>
    %6 = arith.mulf %5, %4 : vector<8x3072xf32>
    %7 = arith.maximumf %4, %6 : vector<8x3072xf32>
    %c0_6 = arith.constant 0 : index
    %c0_7 = arith.constant 0 : index
    %c0_8 = arith.constant 0 : index
    %8 = vector.load %arg3[%c0_6, %c0_7, %c0_8] : memref<1x8x3072xf32, #tpu.memory_space<vmem>>, vector<1x8x3072xf32>
    %9 = vector.shape_cast %8 : vector<1x8x3072xf32> to vector<8x3072xf32>
    %10 = vector.shape_cast %7 : vector<8x3072xf32> to vector<1x8x3072xf32>
    tpu.vector_store %arg3[%c0_6, %c0_7, %c0_8], %10 {strides = array<i32>} : memref<1x8x3072xf32, #tpu.memory_space<vmem>>, vector<1x8x3072xf32>,
    return
  }
  func.func @transform_0(%arg0: i32) -> (i32, i32, i32) {
    %c0_i32 = arith.constant 0 : i32
    %c0_i32_0 = arith.constant 0 : i32
    %c0_i32_1 = arith.constant 0 : i32
    return %arg0, %c0_i32, %c0_i32_0 : i32, i32, i32
  }
  func.func @transform_1(%arg0: i32) -> (i32, i32, i32) {
    %c0_i32 = arith.constant 0 : i32
    %c0_i32_0 = arith.constant 0 : i32
    %c0_i32_1 = arith.constant 0 : i32
    return %arg0, %c0_i32, %c0_i32_0 : i32, i32, i32
  }
  func.func @transform_2(%arg0: i32) -> (i32, i32, i32) {
    %c0_i32 = arith.constant 0 : i32
    %c0_i32_0 = arith.constant 0 : i32
    %c0_i32_1 = arith.constant 0 : i32
    return %arg0, %c0_i32, %c0_i32_0 : i32, i32, i32
  }
}

module attributes {stable_mosaic.version = 11 : i64} {
  func.func @kernel(%arg0: i32, %arg1: memref<1x8x72xf32, #tpu.memory_space<vmem>>, %arg2: memref<1x72x3072xf32, #tpu.memory_space<vmem>>, %arg3: memref<1x8x3072xf32, #tpu.memory_space<vmem>>) attributes {dimension_semantics = [#tpu.dimension_semantics<parallel>], iteration_bounds = array<i64: 1>, scalar_prefetch = 0 : i64, scratch_operands = 0 : i64, tpu.core_type = #tpu.core_type<tc>, window_params = [{transform_indices = @transform_0, window_bounds = array<i64: 1, 8, 72>}, {transform_indices = @transform_1, window_bounds = array<i64: 1, 72, 3072>}, {transform_indices = @transform_2, window_bounds = array<i64: 1, 8, 3072>}]} {
    %c0 = arith.constant 0 : index
    %c0_0 = arith.constant 0 : index
    %c0_1 = arith.constant 0 : index
    %0 = vector.load %arg1[%c0, %c0_0, %c0_1] : memref<1x8x72xf32, #tpu.memory_space<vmem>>, vector<1x8x72xf32>
    %1 = vector.shape_cast %0 : vector<1x8x72xf32> to vector<8x72xf32>
    %c0_2 = arith.constant 0 : index
    %c0_3 = arith.constant 0 : index
    %c0_4 = arith.constant 0 : index
    %2 = vector.load %arg2[%c0_2, %c0_3, %c0_4] : memref<1x72x3072xf32, #tpu.memory_space<vmem>>, vector<1x72x3072xf32>
    %3 = vector.shape_cast %2 : vector<1x72x3072xf32> to vector<72x3072xf32>
    %cst = arith.constant dense<0.000000e+00> : vector<8x3072xf32>
    %4 = tpu.matmul %1, %3, %cst {dimension_numbers = #tpu.dot_dimension_numbers<[1], [0], [0], [1], [0, 0, 1, 1], [], []>} : vector<8x72xf32>, vector<72x3072xf32>, vector<8x3072xf32> -> vector<8x3072xf32>
    %c0_5 = arith.constant 0 : index
    %c0_6 = arith.constant 0 : index
    %c0_7 = arith.constant 0 : index
    %5 = vector.load %arg3[%c0_5, %c0_6, %c0_7] : memref<1x8x3072xf32, #tpu.memory_space<vmem>>, vector<1x8x3072xf32>
    %6 = vector.shape_cast %5 : vector<1x8x3072xf32> to vector<8x3072xf32>
    %7 = vector.shape_cast %4 : vector<8x3072xf32> to vector<1x8x3072xf32>
    tpu.vector_store %arg3[%c0_5, %c0_6, %c0_7], %7 {strides = array<i32>} : memref<1x8x3072xf32, #tpu.memory_space<vmem>>, vector<1x8x3072xf32>,
    return
  }
  func.func @transform_0(%arg0: i32) -> (i32, i32, i32) {
    %c0_i32 = arith.constant 0 : i32
    %c0_i32_0 = arith.constant 0 : i32
    %c0_i32_1 = arith.constant 0 : i32
    return %arg0, %c0_i32, %c0_i32_0 : i32, i32, i32
  }
  func.func @transform_1(%arg0: i32) -> (i32, i32, i32) {
    %c0_i32 = arith.constant 0 : i32
    %c0_i32_0 = arith.constant 0 : i32
    %c0_i32_1 = arith.constant 0 : i32
    return %arg0, %c0_i32, %c0_i32_0 : i32, i32, i32
  }
  func.func @transform_2(%arg0: i32) -> (i32, i32, i32) {
    %c0_i32 = arith.constant 0 : i32
    %c0_i32_0 = arith.constant 0 : i32
    %c0_i32_1 = arith.constant 0 : i32
    return %arg0, %c0_i32, %c0_i32_0 : i32, i32, i32
  }
}

</mosaic_0001>

<bundles_post_ra>
// kernel: fe_fwd.7
= control target key start
LH: loop header
LB: loop body
LE: loop exit
PB: predicated region body
PF: predicated region fallthrough
CT: control target
= control target key end

     0   :  { %vm112_vm0 = vcmask 1040384   ;;  %v1271_v3 = vmov 0.0   ;;  %vm1272_vm1 = vmmov 1   ;;  %vm108_vm3 = vcmask 203776   ;;  %s1742_s1 = inlined_call_operand.vmem [shape: f32[1,25,3072], index: 1, kind: input, shape index: {}]   ;;  %s1743_s0 = inlined_call_operand.vmem [shape: f32[1,8,25], index: 0, kind: input, shape index: {}]   ;;  %s1744_s2 = inlined_call_operand.vmem [shape: f32[1,8,3072], index: 2, kind: output, shape index: {}]  }
   0x1   :  { %v13_v0 = vld [vmem:[%s1742_s1 + $0x8] sm:$0xff]  ;;  %v15_v2 = vld [vmem:[%s1742_s1 + $0x18] sm:$0xff]  ;;  %249 = vmatprep.mubr.f32.mxu0 %v1271_v3  ;;  %320 = vmatprep.mubr.f32.mxu1 %v1271_v3  ;;  %v12_v6 = vld [vmem:[%s1742_s1] sm:$0xff] }
   0x2   :  { %v37_v1 = vld [vmem:[%s1742_s1 + $0xc8] sm:$0xff]  ;;  %v39_v5 = vld [vmem:[%s1742_s1 + $0xd8] sm:$0xff]  ;;  %v36_v7 = vld [vmem:[%s1742_s1 + $0xc0] sm:$0xff] }
   0x3   :  { %v1149_v4 = vpack.c.bf16 %v37_v1, %v13_v0  ;;  %v1159_v8 = vpack.c.bf16 %v39_v5, %v15_v2  ;;  %v1151_v9 = vpack.c.bf16 %v36_v7, %v12_v6  ;;  %v14_v10 = vld [vmem:[%s1742_s1 + $0x10] sm:$0xff]  ;;  %v61_v12 = vld [vmem:[%s1742_s1 + $0x188] sm:$0xff]  ;;  %vm1321_vm2 = vmpackc.low %vm112_vm0, %vm1272_vm1 }
   0x4   :  { %v38_v11 = vld [vmem:[%s1742_s1 + $0xd0] sm:$0xff]  ;;  %v85_v14 = vld [vmem:[%s1742_s1 + $0x248] sm:$0x1]  ;;  %v63_v16 = vld [vmem:[%s1742_s1 + $0x198] sm:$0xff] }
   0x5   :  { %1150 = vmatprep.subr.bf16.mxu0 %v1149_v4  ;;  %v1161_v13 = vpack.c.bf16 %v38_v11, %v14_v10  ;;  %1160 = vmatprep.subr.bf16.mxu1 %v1159_v8  ;;  %v1153_v17 = vpack.c.bf16 %v85_v14, %v61_v12  ;;  %v87_v18 = vld [vmem:[%s1742_s1 + $0x258] sm:$0x1]  ;;  %v60_v19 = vld [vmem:[%s1742_s1 + $0x180] sm:$0xff]  ;;  %v62_v23 = vld [vmem:[%s1742_s1 + $0x190] sm:$0xff] }
   0x6   :  { %1152 = vmatpush1.bf16.msra.mxu0 %v1151_v9  ;;  %v84_v20 = vld [vmem:[%s1742_s1 + $0x240] sm:$0x1]  ;;  %v1163_v21 = vpack.c.bf16 %v87_v18, %v63_v16  ;;  %v86_v24 = vld [vmem:[%s1742_s1 + $0x250] sm:$0x1]  ;;  %v17_v27 = vld [vmem:[%s1742_s1 + $0x28] sm:$0xff] }
   0x7   :  { %1162 = vmatpush1.bf16.msra.mxu1 %v1161_v13  ;;  %v1156_v22 = vpack.c.bf16 %v84_v20, %v60_v19  ;;  %1155 = vmatprep.subr.msk.bf16.mxu0 %vm1321_vm2, %v1153_v17  ;;  %v1166_v25 = vpack.c.bf16 %v86_v24, %v62_v23  ;;  %v1348_v26 = vld [vmem:[%s1743_s0] sm:$0xff]  ;;  %v41_v28 = vld [vmem:[%s1742_s1 + $0xe8] sm:$0xff]  ;;  %v19_v29 = vld [vmem:[%s1742_s1 + $0x38] sm:$0xff] }
   0x8   :  { %1165 = vmatprep.subr.msk.bf16.mxu1 %vm1321_vm2, %v1163_v21  ;;  %v1169_v30 = vpack.c.bf16 %v41_v28, %v17_v27  ;;  %v43_v31 = vld [vmem:[%s1742_s1 + $0xf8] sm:$0xff]  ;;  %v16_v32 = vld [vmem:[%s1742_s1 + $0x20] sm:$0xff]  ;;  %v18_v36 = vld [vmem:[%s1742_s1 + $0x30] sm:$0xff] }
   0x9   :  { %v40_v33 = vld [vmem:[%s1742_s1 + $0xe0] sm:$0xff]  ;;  %v1179_v34 = vpack.c.bf16 %v43_v31, %v19_v29  ;;  %v42_v37 = vld [vmem:[%s1742_s1 + $0xf0] sm:$0xff]  ;;  %v65_v38 = vld [vmem:[%s1742_s1 + $0x1a8] sm:$0xff] }
   0xa   :  { %1158 = vmatpush1.bf16.msk.msra.mxu0 %vm1321_vm2, %v1156_v22  ;;  %v1171_v35 = vpack.c.bf16 %v40_v33, %v16_v32  ;;  %v1181_v39 = vpack.c.bf16 %v42_v37, %v18_v36  ;;  %v89_v40 = vld [vmem:[%s1742_s1 + $0x268] sm:$0x1]  ;;  %v67_v41 = vld [vmem:[%s1742_s1 + $0x1b8] sm:$0xff]  ;;  %v64_v45 = vld [vmem:[%s1742_s1 + $0x1a0] sm:$0xff] }
   0xb   :  { %1168 = vmatpush1.bf16.msk.msra.mxu1 %vm1321_vm2, %v1166_v25  ;;  %1170 = vmatprep.subr.bf16.mxu0 %v1169_v30  ;;  %v91_v42 = vld [vmem:[%s1742_s1 + $0x278] sm:$0x1]  ;;  %v1173_v43 = vpack.c.bf16 %v89_v40, %v65_v38  ;;  %v88_v46 = vld [vmem:[%s1742_s1 + $0x260] sm:$0x1]  ;;  %v66_v47 = vld [vmem:[%s1742_s1 + $0x1b0] sm:$0xff] }
   0xc   :  { %1180 = vmatprep.subr.bf16.mxu1 %v1179_v34  ;;  %v1183_v44 = vpack.c.bf16 %v91_v42, %v67_v41  ;;  %v90_v48 = vld [vmem:[%s1742_s1 + $0x270] sm:$0x1]  ;;  %v21_v49 = vld [vmem:[%s1742_s1 + $0x48] sm:$0xff]  ;;  %v1176_v51 = vpack.c.bf16 %v88_v46, %v64_v45  ;;  %v23_v52 = vld [vmem:[%s1742_s1 + $0x58] sm:$0xff] }
   0xd   :  { %1115 = vmatmul.mubr.msk.f32.vlgmr.msra.gmra.mrb[0].mxu0 %vm108_vm3, %v1348_v26  ;;  %v45_v50 = vld [vmem:[%s1742_s1 + $0x108] sm:$0xff]  ;;  %v47_v53 = vld [vmem:[%s1742_s1 + $0x118] sm:$0xff]  ;;  %v1186_v54 = vpack.c.bf16 %v90_v48, %v66_v47  ;;  %v20_v56 = vld [vmem:[%s1742_s1 + $0x40] sm:$0xff] }
   0xe   :  { %1118 = vmatmul.mubr.msk.f32.vlgmr.msra.gmra.mrb[0].mxu1 %vm108_vm3, %v1348_v26  ;;  %1172 = vmatpush1.bf16.msra.mxu0 %v1171_v35  ;;  %v1189_v55 = vpack.c.bf16 %v45_v50, %v21_v49  ;;  %v44_v57 = vld [vmem:[%s1742_s1 + $0x100] sm:$0xff]  ;;  %v22_v58 = vld [vmem:[%s1742_s1 + $0x50] sm:$0xff]  ;;  %v1199_v59 = vpack.c.bf16 %v47_v53, %v23_v52  ;;  %v69_v61 = vld [vmem:[%s1742_s1 + $0x1c8] sm:$0xff] }
   0xf   :  { %1182 = vmatpush1.bf16.msra.mxu1 %v1181_v39  ;;  %1175 = vmatprep.subr.msk.bf16.mxu0 %vm1321_vm2, %v1173_v43  ;;  %v46_v60 = vld [vmem:[%s1742_s1 + $0x110] sm:$0xff]  ;;  %v93_v62 = vld [vmem:[%s1742_s1 + $0x288] sm:$0x1]  ;;  %v71_v63 = vld [vmem:[%s1742_s1 + $0x1d8] sm:$0xff]  ;;  %v1191_v1 = vpack.c.bf16 %v44_v57, %v20_v56 }
  0x10   :  { %1185 = vmatprep.subr.msk.bf16.mxu1 %vm1321_vm2, %v1183_v44  ;;  %391 = vmatprep.mubr.f32.mxu0 %v1271_v3  ;;  %v95_v0 = vld [vmem:[%s1742_s1 + $0x298] sm:$0x1]  ;;  %v1201_v2 = vpack.c.bf16 %v46_v60, %v22_v58  ;;  %v1193_v4 = vpack.c.bf16 %v93_v62, %v69_v61  ;;  %v68_v5 = vld [vmem:[%s1742_s1 + $0x1c0] sm:$0xff]  ;;  %v70_v7 = vld [vmem:[%s1742_s1 + $0x1d0] sm:$0xff] }
  0x11   :  { %462 = vmatprep.mubr.f32.mxu1 %v1271_v3  ;;  %v92_v6 = vld [vmem:[%s1742_s1 + $0x280] sm:$0x1]  ;;  %v1203_v8 = vpack.c.bf16 %v95_v0, %v71_v63  ;;  %v94_v9 = vld [vmem:[%s1742_s1 + $0x290] sm:$0x1]  ;;  %v25_v10 = vld [vmem:[%s1742_s1 + $0x68] sm:$0xff] }
  0x12   :  { %1178 = vmatpush1.bf16.msk.msra.mxu0 %vm1321_vm2, %v1176_v51  ;;  %v49_v11 = vld [vmem:[%s1742_s1 + $0x128] sm:$0xff]  ;;  %v27_v12 = vld [vmem:[%s1742_s1 + $0x78] sm:$0xff]  ;;  %v1196_v14 = vpack.c.bf16 %v92_v6, %v68_v5  ;;  %v1206_v16 = vpack.c.bf16 %v94_v9, %v70_v7  ;;  %v24_v18 = vld [vmem:[%s1742_s1 + $0x60] sm:$0xff] }
  0x13   :  { %1188 = vmatpush1.bf16.msk.msra.mxu1 %vm1321_vm2, %v1186_v54  ;;  %1190 = vmatprep.subr.bf16.mxu0 %v1189_v55  ;;  %v51_v13 = vld [vmem:[%s1742_s1 + $0x138] sm:$0xff]  ;;  %v1209_v17 = vpack.c.bf16 %v49_v11, %v25_v10  ;;  %v48_v19 = vld [vmem:[%s1742_s1 + $0x120] sm:$0xff]  ;;  %v26_v20 = vld [vmem:[%s1742_s1 + $0x70] sm:$0xff] }
  0x14   :  { %1200 = vmatprep.subr.bf16.mxu1 %v1199_v59  ;;  %v1219_v21 = vpack.c.bf16 %v51_v13, %v27_v12  ;;  %v50_v22 = vld [vmem:[%s1742_s1 + $0x130] sm:$0xff]  ;;  %v73_v23 = vld [vmem:[%s1742_s1 + $0x1e8] sm:$0xff]  ;;  %v75_v25 = vld [vmem:[%s1742_s1 + $0x1f8] sm:$0xff]  ;;  %v1211_v28 = vpack.c.bf16 %v48_v19, %v24_v18 }
  0x15   :  { %1121 = vmatmul.mubr.msk.f32.vlgmr.msra.gmra.mrb[2].mxu0 %vm108_vm3, %v1348_v26  ;;  %v97_v24 = vld [vmem:[%s1742_s1 + $0x2a8] sm:$0x1]  ;;  %v99_v27 = vld [vmem:[%s1742_s1 + $0x2b8] sm:$0x1]  ;;  %v1221_v29 = vpack.c.bf16 %v50_v22, %v26_v20  ;;  %v72_v31 = vld [vmem:[%s1742_s1 + $0x1e0] sm:$0xff] }
  0x16   :  { %1124 = vmatmul.mubr.msk.f32.vlgmr.msra.gmra.mrb[2].mxu1 %vm108_vm3, %v1348_v26  ;;  %1192 = vmatpush1.bf16.msra.mxu0 %v1191_v1  ;;  %v1213_v30 = vpack.c.bf16 %v97_v24, %v73_v23  ;;  %v96_v32 = vld [vmem:[%s1742_s1 + $0x2a0] sm:$0x1]  ;;  %v74_v33 = vld [vmem:[%s1742_s1 + $0x1f0] sm:$0xff]  ;;  %v1223_v34 = vpack.c.bf16 %v99_v27, %v75_v25  ;;  %v29_v36 = vld [vmem:[%s1742_s1 + $0x88] sm:$0xff] }
  0x17   :  { %1202 = vmatpush1.bf16.msra.mxu1 %v1201_v2  ;;  %1195 = vmatprep.subr.msk.bf16.mxu0 %vm1321_vm2, %v1193_v4  ;;  %v98_v35 = vld [vmem:[%s1742_s1 + $0x2b0] sm:$0x1]  ;;  %v53_v37 = vld [vmem:[%s1742_s1 + $0x148] sm:$0xff]  ;;  %v31_v38 = vld [vmem:[%s1742_s1 + $0x98] sm:$0xff]  ;;  %v1216_v40 = vpack.c.bf16 %v96_v32, %v72_v31 }
  0x18   :  { %1205 = vmatprep.subr.msk.bf16.mxu1 %vm1321_vm2, %v1203_v8  ;;  %533 = vmatprep.mubr.f32.mxu0 %v1271_v3  ;;  %v55_v39 = vld [vmem:[%s1742_s1 + $0x158] sm:$0xff]  ;;  %v1226_v41 = vpack.c.bf16 %v98_v35, %v74_v33  ;;  %v1229_v42 = vpack.c.bf16 %v53_v37, %v29_v36  ;;  %v28_v43 = vld [vmem:[%s1742_s1 + $0x80] sm:$0xff]  ;;  %v30_v45 = vld [vmem:[%s1742_s1 + $0x90] sm:$0xff] }
  0x19   :  { %604 = vmatprep.mubr.f32.mxu1 %v1271_v3  ;;  %v52_v44 = vld [vmem:[%s1742_s1 + $0x140] sm:$0xff]  ;;  %v1239_v46 = vpack.c.bf16 %v55_v39, %v31_v38  ;;  %v54_v47 = vld [vmem:[%s1742_s1 + $0x150] sm:$0xff]  ;;  %v77_v48 = vld [vmem:[%s1742_s1 + $0x208] sm:$0xff] }
  0x1a   :  { %1198 = vmatpush1.bf16.msk.msra.mxu0 %vm1321_vm2, %v1196_v14  ;;  %v101_v49 = vld [vmem:[%s1742_s1 + $0x2c8] sm:$0x1]  ;;  %v79_v50 = vld [vmem:[%s1742_s1 + $0x218] sm:$0xff]  ;;  %v1231_v52 = vpack.c.bf16 %v52_v44, %v28_v43  ;;  %v1241_v53 = vpack.c.bf16 %v54_v47, %v30_v45  ;;  %v76_v55 = vld [vmem:[%s1742_s1 + $0x200] sm:$0xff] }
  0x1b   :  { %1208 = vmatpush1.bf16.msk.msra.mxu1 %vm1321_vm2, %v1206_v16  ;;  %1210 = vmatprep.subr.bf16.mxu0 %v1209_v17  ;;  %v103_v51 = vld [vmem:[%s1742_s1 + $0x2d8] sm:$0x1]  ;;  %v1233_v54 = vpack.c.bf16 %v101_v49, %v77_v48  ;;  %v100_v56 = vld [vmem:[%s1742_s1 + $0x2c0] sm:$0x1]  ;;  %v78_v57 = vld [vmem:[%s1742_s1 + $0x210] sm:$0xff] }
  0x1c   :  { %1220 = vmatprep.subr.bf16.mxu1 %v1219_v21  ;;  %v1243_v58 = vpack.c.bf16 %v103_v51, %v79_v50  ;;  %v102_v59 = vld [vmem:[%s1742_s1 + $0x2d0] sm:$0x1]  ;;  %v33_v60 = vld [vmem:[%s1742_s1 + $0xa8] sm:$0xff]  ;;  %v35_v62 = vld [vmem:[%s1742_s1 + $0xb8] sm:$0xff]  ;;  %v1236_v0 = vpack.c.bf16 %v100_v56, %v76_v55 }
  0x1d   :  { %1127 = vmatmul.mubr.msk.f32.vlgmr.msra.gmra.mrb[4].mxu0 %vm108_vm3, %v1348_v26  ;;  %v57_v61 = vld [vmem:[%s1742_s1 + $0x168] sm:$0xff]  ;;  %v59_v63 = vld [vmem:[%s1742_s1 + $0x178] sm:$0xff]  ;;  %v1246_v1 = vpack.c.bf16 %v102_v59, %v78_v57  ;;  %v32_v4 = vld [vmem:[%s1742_s1 + $0xa0] sm:$0xff] }
  0x1e   :  { %1130 = vmatmul.mubr.msk.f32.vlgmr.msra.gmra.mrb[4].mxu1 %vm108_vm3, %v1348_v26  ;;  %1212 = vmatpush1.bf16.msra.mxu0 %v1211_v28  ;;  %v1249_v2 = vpack.c.bf16 %v57_v61, %v33_v60  ;;  %v56_v5 = vld [vmem:[%s1742_s1 + $0x160] sm:$0xff]  ;;  %v34_v6 = vld [vmem:[%s1742_s1 + $0xb0] sm:$0xff]  ;;  %v1259_v7 = vpack.c.bf16 %v59_v63, %v35_v62  ;;  %v81_v9 = vld [vmem:[%s1742_s1 + $0x228] sm:$0xff] }
  0x1f   :  { %1222 = vmatpush1.bf16.msra.mxu1 %v1221_v29  ;;  %1215 = vmatprep.subr.msk.bf16.mxu0 %vm1321_vm2, %v1213_v30  ;;  %v58_v8 = vld [vmem:[%s1742_s1 + $0x170] sm:$0xff]  ;;  %v105_v10 = vld [vmem:[%s1742_s1 + $0x2e8] sm:$0x1]  ;;  %v83_v11 = vld [vmem:[%s1742_s1 + $0x238] sm:$0xff]  ;;  %v1251_v13 = vpack.c.bf16 %v56_v5, %v32_v4 }
  0x20   :  { %1225 = vmatprep.subr.msk.bf16.mxu1 %vm1321_vm2, %v1223_v34  ;;  %675 = vmatprep.mubr.f32.mxu0 %v1271_v3  ;;  %v107_v12 = vld [vmem:[%s1742_s1 + $0x2f8] sm:$0x1]  ;;  %v1261_v14 = vpack.c.bf16 %v58_v8, %v34_v6  ;;  %v1253_v16 = vpack.c.bf16 %v105_v10, %v81_v9  ;;  %v80_v17 = vld [vmem:[%s1742_s1 + $0x220] sm:$0xff]  ;;  %v82_v20 = vld [vmem:[%s1742_s1 + $0x230] sm:$0xff] }
  0x21   :  { %746 = vmatprep.mubr.f32.mxu1 %v1271_v3  ;;  %v104_v18 = vld [vmem:[%s1742_s1 + $0x2e0] sm:$0x1]  ;;  %v1263_v19 = vpack.c.bf16 %v107_v12, %v83_v11  ;;  %v106_v21 = vld [vmem:[%s1742_s1 + $0x2f0] sm:$0x1] }
  0x22   :  { %1218 = vmatpush1.bf16.msk.msra.mxu0 %vm1321_vm2, %v1216_v40  ;;  %v1256_v22 = vpack.c.bf16 %v104_v18, %v80_v17  ;;  %v1266_v23 = vpack.c.bf16 %v106_v21, %v82_v20 }
  0x23   :  { %1228 = vmatpush1.bf16.msk.msra.mxu1 %vm1321_vm2, %v1226_v41  ;;  %1230 = vmatprep.subr.bf16.mxu0 %v1229_v42 }
  0x24   :  { %1240 = vmatprep.subr.bf16.mxu1 %v1239_v46 }
  0x25   :  { %1133 = vmatmul.mubr.msk.f32.vlgmr.msra.gmra.mrb[6].mxu0 %vm108_vm3, %v1348_v26 }
  0x26   :  { %1136 = vmatmul.mubr.msk.f32.vlgmr.msra.gmra.mrb[6].mxu1 %vm108_vm3, %v1348_v26  ;;  %1232 = vmatpush1.bf16.msra.mxu0 %v1231_v52 }
  0x27   :  { %1242 = vmatpush1.bf16.msra.mxu1 %v1241_v53  ;;  %1235 = vmatprep.subr.msk.bf16.mxu0 %vm1321_vm2, %v1233_v54 }
  0x28   :  { %1245 = vmatprep.subr.msk.bf16.mxu1 %vm1321_vm2, %v1243_v58  ;;  %817 = vmatprep.mubr.f32.mxu0 %v1271_v3 }
  0x29   :  { %888 = vmatprep.mubr.f32.mxu1 %v1271_v3 }
  0x2a   :  { %1238 = vmatpush1.bf16.msk.msra.mxu0 %vm1321_vm2, %v1236_v0 }
  0x2b   :  { %1248 = vmatpush1.bf16.msk.msra.mxu1 %vm1321_vm2, %v1246_v1  ;;  %1250 = vmatprep.subr.bf16.mxu0 %v1249_v2 }
  0x2c   :  { %1260 = vmatprep.subr.bf16.mxu1 %v1259_v7 }
  0x2d   :  { %1139 = vmatmul.mubr.msk.f32.vlgmr.msra.gmra.mrb[8].mxu0 %vm108_vm3, %v1348_v26 }
  0x2e   :  { %1142 = vmatmul.mubr.msk.f32.vlgmr.msra.gmra.mrb[8].mxu1 %vm108_vm3, %v1348_v26  ;;  %1252 = vmatpush1.bf16.msra.mxu0 %v1251_v13 }
  0x2f   :  { %1262 = vmatpush1.bf16.msra.mxu1 %v1261_v14  ;;  %1255 = vmatprep.subr.msk.bf16.mxu0 %vm1321_vm2, %v1253_v16 }
  0x30   :  { %1265 = vmatprep.subr.msk.bf16.mxu1 %vm1321_vm2, %v1263_v19  ;;  %959 = vmatprep.mubr.f32.mxu0 %v1271_v3 }
  0x31   :  { %1030 = vmatprep.mubr.f32.mxu1 %v1271_v3 }
  0x32   :  { %1258 = vmatpush1.bf16.msk.msra.mxu0 %vm1321_vm2, %v1256_v22 }
  0x33   :  { %1268 = vmatpush1.bf16.msk.msra.mxu1 %vm1321_vm2, %v1266_v23 }
  0x35   :  { %1145 = vmatmul.mubr.msk.f32.vlgmr.msra.gmra.mrb[10].mxu0 %vm108_vm3, %v1348_v26 }
  0x36   :  { %1148 = vmatmul.mubr.msk.f32.vlgmr.msra.gmra.mrb[10].mxu1 %vm108_vm3, %v1348_v26 }
  0xe0   :  { %v251_v24 = vpop.f32.mrb[0].mxu0 }
  0xe1   :  { %v1037_v25 = vmul.f32 0.2, %v251_v24  ;;  %v322_v27 = vpop.f32.mrb[0].mxu1  ;;  %v253_v28 = vpop.f32.mrb[1].mxu0 }
  0xe2   :  { %v1039_v29 = vmul.f32 0.2, %v322_v27  ;;  %v1038_v30 = vmul.f32 0.2, %v253_v28  ;;  %v324_v31 = vpop.f32.mrb[1].mxu1 }
  0xe3   :  { %v1061_v3 = vmax.f32 %v251_v24, %v1037_v25  ;;  %v1040_v32 = vmul.f32 0.2, %v324_v31 }
  0xe4   :  { %v1063_v33 = vmax.f32 %v322_v27, %v1039_v29  ;;  %v1062_v34 = vmax.f32 %v253_v28, %v1038_v30 }
  0xe5   :  { %1085 = vst [vmem:[%s1744_s2] sm:$0xff] %v1061_v3  ;;  %v1064_v15 = vmax.f32 %v324_v31, %v1040_v32 }
  0xe6   :  { %1087 = vst [vmem:[%s1744_s2 + $0x10] sm:$0xff] %v1063_v33  ;;  %1086 = vst [vmem:[%s1744_s2 + $0x8] sm:$0xff] %v1062_v34 }
  0xe7   :  { %1088 = vst [vmem:[%s1744_s2 + $0x18] sm:$0xff] %v1064_v15 }
  0xe8   :  { %v393_v26 = vpop.f32.mrb[2].mxu0 }
  0xe9   :  { %v1041_v35 = vmul.f32 0.2, %v393_v26  ;;  %v464_v36 = vpop.f32.mrb[2].mxu1  ;;  %v395_v37 = vpop.f32.mrb[3].mxu0 }
  0xea   :  { %v1043_v38 = vmul.f32 0.2, %v464_v36  ;;  %v1042_v39 = vmul.f32 0.2, %v395_v37  ;;  %v466_v40 = vpop.f32.mrb[3].mxu1 }
  0xeb   :  { %v1065_v41 = vmax.f32 %v393_v26, %v1041_v35  ;;  %v1044_v42 = vmul.f32 0.2, %v466_v40 }
  0xec   :  { %v1067_v43 = vmax.f32 %v464_v36, %v1043_v38  ;;  %v1066_v44 = vmax.f32 %v395_v37, %v1042_v39 }
  0xed   :  { %1089 = vst [vmem:[%s1744_s2 + $0x20] sm:$0xff] %v1065_v41  ;;  %v1068_v45 = vmax.f32 %v466_v40, %v1044_v42 }
  0xee   :  { %1091 = vst [vmem:[%s1744_s2 + $0x30] sm:$0xff] %v1067_v43  ;;  %1090 = vst [vmem:[%s1744_s2 + $0x28] sm:$0xff] %v1066_v44 }
  0xef   :  { %1092 = vst [vmem:[%s1744_s2 + $0x38] sm:$0xff] %v1068_v45 }
  0xf0   :  { %v535_v46 = vpop.f32.mrb[4].mxu0 }
  0xf1   :  { %v1045_v47 = vmul.f32 0.2, %v535_v46  ;;  %v606_v48 = vpop.f32.mrb[4].mxu1  ;;  %v537_v49 = vpop.f32.mrb[5].mxu0 }
  0xf2   :  { %v1047_v50 = vmul.f32 0.2, %v606_v48  ;;  %v1046_v51 = vmul.f32 0.2, %v537_v49  ;;  %v608_v52 = vpop.f32.mrb[5].mxu1 }
  0xf3   :  { %v1069_v53 = vmax.f32 %v535_v46, %v1045_v47  ;;  %v1048_v54 = vmul.f32 0.2, %v608_v52 }
  0xf4   :  { %v1071_v55 = vmax.f32 %v606_v48, %v1047_v50  ;;  %v1070_v56 = vmax.f32 %v537_v49, %v1046_v51 }
  0xf5   :  { %1093 = vst [vmem:[%s1744_s2 + $0x40] sm:$0xff] %v1069_v53  ;;  %v1072_v57 = vmax.f32 %v608_v52, %v1048_v54 }
  0xf6   :  { %1095 = vst [vmem:[%s1744_s2 + $0x50] sm:$0xff] %v1071_v55  ;;  %1094 = vst [vmem:[%s1744_s2 + $0x48] sm:$0xff] %v1070_v56 }
  0xf7   :  { %1096 = vst [vmem:[%s1744_s2 + $0x58] sm:$0xff] %v1072_v57 }
  0xf8   :  { %v677_v58 = vpop.f32.mrb[6].mxu0 }
  0xf9   :  { %v1049_v59 = vmul.f32 0.2, %v677_v58  ;;  %v748_v60 = vpop.f32.mrb[6].mxu1  ;;  %v679_v61 = vpop.f32.mrb[7].mxu0 }
  0xfa   :  { %v1051_v62 = vmul.f32 0.2, %v748_v60  ;;  %v1050_v63 = vmul.f32 0.2, %v679_v61  ;;  %v750_v0 = vpop.f32.mrb[7].mxu1 }
  0xfb   :  { %v1073_v1 = vmax.f32 %v677_v58, %v1049_v59  ;;  %v1052_v2 = vmul.f32 0.2, %v750_v0 }
  0xfc   :  { %v1075_v4 = vmax.f32 %v748_v60, %v1051_v62  ;;  %v1074_v5 = vmax.f32 %v679_v61, %v1050_v63 }
  0xfd   :  { %1097 = vst [vmem:[%s1744_s2 + $0x60] sm:$0xff] %v1073_v1  ;;  %v1076_v6 = vmax.f32 %v750_v0, %v1052_v2 }
  0xfe   :  { %1099 = vst [vmem:[%s1744_s2 + $0x70] sm:$0xff] %v1075_v4  ;;  %1098 = vst [vmem:[%s1744_s2 + $0x68] sm:$0xff] %v1074_v5 }
  0xff   :  { %1100 = vst [vmem:[%s1744_s2 + $0x78] sm:$0xff] %v1076_v6 }
 0x100   :  { %v819_v7 = vpop.f32.mrb[8].mxu0 }
 0x101   :  { %v1053_v8 = vmul.f32 0.2, %v819_v7  ;;  %v890_v9 = vpop.f32.mrb[8].mxu1  ;;  %v821_v10 = vpop.f32.mrb[9].mxu0 }
 0x102   :  { %v1055_v11 = vmul.f32 0.2, %v890_v9  ;;  %v1054_v12 = vmul.f32 0.2, %v821_v10  ;;  %v892_v13 = vpop.f32.mrb[9].mxu1 }
 0x103   :  { %v1077_v14 = vmax.f32 %v819_v7, %v1053_v8  ;;  %v1056_v16 = vmul.f32 0.2, %v892_v13 }
 0x104   :  { %v1079_v17 = vmax.f32 %v890_v9, %v1055_v11  ;;  %v1078_v18 = vmax.f32 %v821_v10, %v1054_v12 }
 0x105   :  { %1101 = vst [vmem:[%s1744_s2 + $0x80] sm:$0xff] %v1077_v14  ;;  %v1080_v19 = vmax.f32 %v892_v13, %v1056_v16 }
 0x106   :  { %1103 = vst [vmem:[%s1744_s2 + $0x90] sm:$0xff] %v1079_v17  ;;  %1102 = vst [vmem:[%s1744_s2 + $0x88] sm:$0xff] %v1078_v18 }
 0x107   :  { %1104 = vst [vmem:[%s1744_s2 + $0x98] sm:$0xff] %v1080_v19 }
 0x108   :  { %v961_v20 = vpop.f32.mrb[10].mxu0 }
 0x109   :  { %v1057_v21 = vmul.f32 0.2, %v961_v20  ;;  %v1032_v22 = vpop.f32.mrb[10].mxu1  ;;  %v963_v23 = vpop.f32.mrb[11].mxu0 }
 0x10a   :  { %v1059_v24 = vmul.f32 0.2, %v1032_v22  ;;  %v1058_v25 = vmul.f32 0.2, %v963_v23  ;;  %v1034_v27 = vpop.f32.mrb[11].mxu1 }
 0x10b   :  { %v1081_v28 = vmax.f32 %v961_v20, %v1057_v21  ;;  %v1060_v29 = vmul.f32 0.2, %v1034_v27 }
 0x10c   :  { %v1083_v30 = vmax.f32 %v1032_v22, %v1059_v24  ;;  %v1082_v31 = vmax.f32 %v963_v23, %v1058_v25 }
 0x10d   :  { %1105 = vst [vmem:[%s1744_s2 + $0xa0] sm:$0xff] %v1081_v28  ;;  %v1084_v3 = vmax.f32 %v1034_v27, %v1060_v29 }
 0x10e   :  { %1107 = vst [vmem:[%s1744_s2 + $0xb0] sm:$0xff] %v1083_v30  ;;  %1106 = vst [vmem:[%s1744_s2 + $0xa8] sm:$0xff] %v1082_v31 }
 0x10f   :  { %1108 = vst [vmem:[%s1744_s2 + $0xb8] sm:$0xff] %v1084_v3 }

// kernel: fe_fwd.8
= control target key start
LH: loop header
LB: loop body
LE: loop exit
PB: predicated region body
PF: predicated region fallthrough
CT: control target
= control target key end

     0   :  { %v1365_v3 = vmov 0.0   ;;  %vm228_vm0 = vcmask 588800   ;;  %s2142_s1 = inlined_call_operand.vmem [shape: f32[1,72,3072], index: 1, kind: input, shape index: {}]   ;;  %s2143_s0 = inlined_call_operand.vmem [shape: f32[1,8,72], index: 0, kind: input, shape index: {}]   ;;  %s2144_s2 = inlined_call_operand.vmem [shape: f32[1,8,3072], index: 2, kind: output, shape index: {}]  }
   0x1   :  { %v13_v0 = vld [vmem:[%s2142_s1 + $0x8] sm:$0xff]  ;;  %v15_v2 = vld [vmem:[%s2142_s1 + $0x18] sm:$0xff]  ;;  %296 = vmatprep.mubr.f32.mxu0 %v1365_v3  ;;  %367 = vmatprep.mubr.f32.mxu1 %v1365_v3  ;;  %v12_v6 = vld [vmem:[%s2142_s1] sm:$0xff] }
   0x2   :  { %v37_v1 = vld [vmem:[%s2142_s1 + $0xc8] sm:$0xff]  ;;  %v39_v5 = vld [vmem:[%s2142_s1 + $0xd8] sm:$0xff]  ;;  %v36_v7 = vld [vmem:[%s2142_s1 + $0xc0] sm:$0xff] }
   0x3   :  { %v1172_v4 = vpack.c.bf16 %v37_v1, %v13_v0  ;;  %v1188_v8 = vpack.c.bf16 %v39_v5, %v15_v2  ;;  %v1174_v9 = vpack.c.bf16 %v36_v7, %v12_v6  ;;  %v14_v10 = vld [vmem:[%s2142_s1 + $0x10] sm:$0xff]  ;;  %v61_v12 = vld [vmem:[%s2142_s1 + $0x188] sm:$0xff]  ;;  %v63_v15 = vld [vmem:[%s2142_s1 + $0x198] sm:$0xff] }
   0x4   :  { %v38_v11 = vld [vmem:[%s2142_s1 + $0xd0] sm:$0xff]  ;;  %v85_v14 = vld [vmem:[%s2142_s1 + $0x248] sm:$0xff]  ;;  %v87_v16 = vld [vmem:[%s2142_s1 + $0x258] sm:$0xff] }
   0x5   :  { %1173 = vmatprep.subr.bf16.mxu0 %v1172_v4  ;;  %v1190_v13 = vpack.c.bf16 %v38_v11, %v14_v10  ;;  %1189 = vmatprep.subr.bf16.mxu1 %v1188_v8  ;;  %v1176_v17 = vpack.c.bf16 %v85_v14, %v61_v12  ;;  %v1192_v18 = vpack.c.bf16 %v87_v16, %v63_v15  ;;  %v60_v19 = vld [vmem:[%s2142_s1 + $0x180] sm:$0xff]  ;;  %v62_v21 = vld [vmem:[%s2142_s1 + $0x190] sm:$0xff]  ;;  %v109_v24 = vld [vmem:[%s2142_s1 + $0x308] sm:$0xff] }
   0x6   :  { %1175 = vmatpush1.bf16.msra.mxu0 %v1174_v9  ;;  %v84_v20 = vld [vmem:[%s2142_s1 + $0x240] sm:$0xff]  ;;  %v86_v23 = vld [vmem:[%s2142_s1 + $0x250] sm:$0xff]  ;;  %v133_v25 = vld [vmem:[%s2142_s1 + $0x3c8] sm:$0xff] }
   0x7   :  { %1191 = vmatpush1.bf16.msra.mxu1 %v1190_v13  ;;  %v1178_v22 = vpack.c.bf16 %v84_v20, %v60_v19  ;;  %1177 = vmatprep.subr.bf16.mxu0 %v1176_v17  ;;  %v1194_v26 = vpack.c.bf16 %v86_v23, %v62_v21  ;;  %v1180_v27 = vpack.c.bf16 %v133_v25, %v109_v24  ;;  %v111_v28 = vld [vmem:[%s2142_s1 + $0x318] sm:$0xff]  ;;  %v108_v30 = vld [vmem:[%s2142_s1 + $0x300] sm:$0xff]  ;;  %v110_v33 = vld [vmem:[%s2142_s1 + $0x310] sm:$0xff] }
   0x8   :  { %1193 = vmatprep.subr.bf16.mxu1 %v1192_v18  ;;  %v135_v29 = vld [vmem:[%s2142_s1 + $0x3d8] sm:$0xff]  ;;  %v132_v32 = vld [vmem:[%s2142_s1 + $0x3c0] sm:$0xff]  ;;  %v134_v34 = vld [vmem:[%s2142_s1 + $0x3d0] sm:$0xff] }
   0x9   :  { %v1196_v31 = vpack.c.bf16 %v135_v29, %v111_v28  ;;  %v1182_v35 = vpack.c.bf16 %v132_v32, %v108_v30  ;;  %v157_v36 = vld [vmem:[%s2142_s1 + $0x488] sm:$0xff]  ;;  %v159_v38 = vld [vmem:[%s2142_s1 + $0x498] sm:$0xff]  ;;  %v1198_v39 = vpack.c.bf16 %v134_v34, %v110_v33  ;;  %v156_v42 = vld [vmem:[%s2142_s1 + $0x480] sm:$0xff] }
   0xa   :  { %1179 = vmatpush1.bf16.msra.mxu0 %v1178_v22  ;;  %v181_v37 = vld [vmem:[%s2142_s1 + $0x548] sm:$0xff]  ;;  %v183_v41 = vld [vmem:[%s2142_s1 + $0x558] sm:$0xff]  ;;  %v180_v43 = vld [vmem:[%s2142_s1 + $0x540] sm:$0xff] }
   0xb   :  { %1195 = vmatpush1.bf16.msra.mxu1 %v1194_v26  ;;  %1181 = vmatprep.subr.bf16.mxu0 %v1180_v27  ;;  %v1184_v40 = vpack.c.bf16 %v181_v37, %v157_v36  ;;  %v1200_v44 = vpack.c.bf16 %v183_v41, %v159_v38  ;;  %v158_v45 = vld [vmem:[%s2142_s1 + $0x490] sm:$0xff]  ;;  %v1186_v47 = vpack.c.bf16 %v180_v43, %v156_v42  ;;  %v205_v49 = vld [vmem:[%s2142_s1 + $0x608] sm:$0xff]  ;;  %v207_v50 = vld [vmem:[%s2142_s1 + $0x618] sm:$0xff] }
   0xc   :  { %1197 = vmatprep.subr.bf16.mxu1 %v1196_v31  ;;  %v182_v46 = vld [vmem:[%s2142_s1 + $0x550] sm:$0xff]  ;;  %v17_v51 = vld [vmem:[%s2142_s1 + $0x28] sm:$0xff]  ;;  %v204_v52 = vld [vmem:[%s2142_s1 + $0x600] sm:$0xff] }
   0xd   :  { %v1202_v48 = vpack.c.bf16 %v182_v46, %v158_v45  ;;  %v41_v53 = vld [vmem:[%s2142_s1 + $0xe8] sm:$0xff]  ;;  %v19_v54 = vld [vmem:[%s2142_s1 + $0x38] sm:$0xff]  ;;  %v206_v56 = vld [vmem:[%s2142_s1 + $0x610] sm:$0xff] }
   0xe   :  { %1183 = vmatpush1.bf16.msra.mxu0 %v1182_v35  ;;  %v43_v55 = vld [vmem:[%s2142_s1 + $0xf8] sm:$0xff]  ;;  %v16_v57 = vld [vmem:[%s2142_s1 + $0x20] sm:$0xff]  ;;  %v18_v59 = vld [vmem:[%s2142_s1 + $0x30] sm:$0xff]  ;;  %v1204_v0 = vpack.c.bf16 %v41_v53, %v17_v51 }
   0xf   :  { %1199 = vmatpush1.bf16.msra.mxu1 %v1198_v39  ;;  %1185 = vmatprep.subr.bf16.mxu0 %v1184_v40  ;;  %v40_v58 = vld [vmem:[%s2142_s1 + $0xe0] sm:$0xff]  ;;  %v42_v60 = vld [vmem:[%s2142_s1 + $0xf0] sm:$0xff]  ;;  %v65_v61 = vld [vmem:[%s2142_s1 + $0x1a8] sm:$0xff]  ;;  %v1220_v4 = vpack.c.bf16 %v43_v55, %v19_v54 }
  0x10   :  { %1201 = vmatprep.subr.bf16.mxu1 %v1200_v44  ;;  %v89_v62 = vld [vmem:[%s2142_s1 + $0x268] sm:$0xff]  ;;  %v1524_v63 = vld [vmem:[%s2143_s0] sm:$0xff]  ;;  %v67_v1 = vld [vmem:[%s2142_s1 + $0x1b8] sm:$0xff]  ;;  %v1206_v5 = vpack.c.bf16 %v40_v58, %v16_v57  ;;  %v1222_v6 = vpack.c.bf16 %v42_v60, %v18_v59 }
  0x11   :  { %v91_v2 = vld [vmem:[%s2142_s1 + $0x278] sm:$0xff]  ;;  %v1208_v7 = vpack.c.bf16 %v89_v62, %v65_v61  ;;  %v64_v8 = vld [vmem:[%s2142_s1 + $0x1a0] sm:$0xff]  ;;  %v66_v10 = vld [vmem:[%s2142_s1 + $0x1b0] sm:$0xff] }
  0x12   :  { %1187 = vmatpush1.bf16.msra.mxu0 %v1186_v47  ;;  %v88_v9 = vld [vmem:[%s2142_s1 + $0x260] sm:$0xff]  ;;  %v1224_v11 = vpack.c.bf16 %v91_v2, %v67_v1  ;;  %v90_v12 = vld [vmem:[%s2142_s1 + $0x270] sm:$0xff]  ;;  %v113_v13 = vld [vmem:[%s2142_s1 + $0x328] sm:$0xff] }
  0x13   :  { %1203 = vmatpush1.bf16.msra.mxu1 %v1202_v48  ;;  %248 = vmatprep.subr.mxu0 %v205_v49  ;;  %v137_v14 = vld [vmem:[%s2142_s1 + $0x3e8] sm:$0xff]  ;;  %v115_v15 = vld [vmem:[%s2142_s1 + $0x338] sm:$0xff]  ;;  %v1210_v17 = vpack.c.bf16 %v88_v9, %v64_v8  ;;  %v1226_v18 = vpack.c.bf16 %v90_v12, %v66_v10  ;;  %v112_v20 = vld [vmem:[%s2142_s1 + $0x320] sm:$0xff] }
  0x14   :  { %319 = vmatprep.subr.mxu1 %v207_v50  ;;  %v139_v16 = vld [vmem:[%s2142_s1 + $0x3f8] sm:$0xff]  ;;  %v1212_v19 = vpack.c.bf16 %v137_v14, %v113_v13  ;;  %v136_v21 = vld [vmem:[%s2142_s1 + $0x3e0] sm:$0xff]  ;;  %v114_v22 = vld [vmem:[%s2142_s1 + $0x330] sm:$0xff] }
  0x15   :  { %v1228_v23 = vpack.c.bf16 %v139_v16, %v115_v15  ;;  %v138_v24 = vld [vmem:[%s2142_s1 + $0x3f0] sm:$0xff]  ;;  %v161_v25 = vld [vmem:[%s2142_s1 + $0x4a8] sm:$0xff]  ;;  %v163_v27 = vld [vmem:[%s2142_s1 + $0x4b8] sm:$0xff]  ;;  %v1214_v29 = vpack.c.bf16 %v136_v21, %v112_v20 }
  0x16   :  { %249 = vmatpush1.msra.mxu0 %v204_v52  ;;  %v185_v26 = vld [vmem:[%s2142_s1 + $0x568] sm:$0xff]  ;;  %v187_v28 = vld [vmem:[%s2142_s1 + $0x578] sm:$0xff]  ;;  %v1230_v30 = vpack.c.bf16 %v138_v24, %v114_v22  ;;  %v160_v32 = vld [vmem:[%s2142_s1 + $0x4a0] sm:$0xff] }
  0x17   :  { %320 = vmatpush1.msra.mxu1 %v206_v56  ;;  %1160 = vmatmul.mubr.msk.f32.vlgmr.msra.gmra.mrb[0].mxu0 %vm228_vm0, %v1524_v63  ;;  %v1216_v31 = vpack.c.bf16 %v185_v26, %v161_v25  ;;  %v184_v33 = vld [vmem:[%s2142_s1 + $0x560] sm:$0xff]  ;;  %v1232_v34 = vpack.c.bf16 %v187_v28, %v163_v27  ;;  %v162_v35 = vld [vmem:[%s2142_s1 + $0x4b0] sm:$0xff]  ;;  %v209_v39 = vld [vmem:[%s2142_s1 + $0x628] sm:$0xff] }
  0x18   :  { %1161 = vmatmul.mubr.msk.f32.vlgmr.msra.gmra.mrb[0].mxu1 %vm228_vm0, %v1524_v63  ;;  %1205 = vmatprep.subr.bf16.mxu0 %v1204_v0  ;;  %v186_v36 = vld [vmem:[%s2142_s1 + $0x570] sm:$0xff]  ;;  %v1218_v37 = vpack.c.bf16 %v184_v33, %v160_v32  ;;  %v211_v40 = vld [vmem:[%s2142_s1 + $0x638] sm:$0xff]  ;;  %v21_v41 = vld [vmem:[%s2142_s1 + $0x48] sm:$0xff] }
  0x19   :  { %1221 = vmatprep.subr.bf16.mxu1 %v1220_v4  ;;  %1207 = vmatpush1.bf16.msra.mxu0 %v1206_v5  ;;  %v1234_v38 = vpack.c.bf16 %v186_v36, %v162_v35  ;;  %v208_v42 = vld [vmem:[%s2142_s1 + $0x620] sm:$0xff]  ;;  %v45_v43 = vld [vmem:[%s2142_s1 + $0x108] sm:$0xff]  ;;  %v23_v44 = vld [vmem:[%s2142_s1 + $0x58] sm:$0xff] }
  0x1a   :  { %1223 = vmatpush1.bf16.msra.mxu1 %v1222_v6  ;;  %1209 = vmatprep.subr.bf16.mxu0 %v1208_v7  ;;  %v47_v45 = vld [vmem:[%s2142_s1 + $0x118] sm:$0xff]  ;;  %v20_v46 = vld [vmem:[%s2142_s1 + $0x40] sm:$0xff]  ;;  %v22_v48 = vld [vmem:[%s2142_s1 + $0x50] sm:$0xff]  ;;  %v1236_v53 = vpack.c.bf16 %v45_v43, %v21_v41 }
  0x1b   :  { %1225 = vmatprep.subr.bf16.mxu1 %v1224_v11  ;;  %438 = vmatprep.mubr.f32.mxu0 %v1365_v3  ;;  %v44_v47 = vld [vmem:[%s2142_s1 + $0x100] sm:$0xff]  ;;  %v46_v49 = vld [vmem:[%s2142_s1 + $0x110] sm:$0xff]  ;;  %v69_v50 = vld [vmem:[%s2142_s1 + $0x1c8] sm:$0xff]  ;;  %v1252_v56 = vpack.c.bf16 %v47_v45, %v23_v44 }
  0x1c   :  { %509 = vmatprep.mubr.f32.mxu1 %v1365_v3  ;;  %v93_v51 = vld [vmem:[%s2142_s1 + $0x288] sm:$0xff]  ;;  %v210_v52 = vld [vmem:[%s2142_s1 + $0x630] sm:$0xff]  ;;  %v71_v54 = vld [vmem:[%s2142_s1 + $0x1d8] sm:$0xff]  ;;  %v1238_v57 = vpack.c.bf16 %v44_v47, %v20_v46  ;;  %v1254_v58 = vpack.c.bf16 %v46_v49, %v22_v48 }
  0x1d   :  { %1211 = vmatpush1.bf16.msra.mxu0 %v1210_v17  ;;  %v95_v55 = vld [vmem:[%s2142_s1 + $0x298] sm:$0xff]  ;;  %v1240_v59 = vpack.c.bf16 %v93_v51, %v69_v50  ;;  %v68_v60 = vld [vmem:[%s2142_s1 + $0x1c0] sm:$0xff]  ;;  %v70_v62 = vld [vmem:[%s2142_s1 + $0x1d0] sm:$0xff] }
  0x1e   :  { %1227 = vmatpush1.bf16.msra.mxu1 %v1226_v18  ;;  %1213 = vmatprep.subr.bf16.mxu0 %v1212_v19  ;;  %v92_v61 = vld [vmem:[%s2142_s1 + $0x280] sm:$0xff]  ;;  %v1256_v0 = vpack.c.bf16 %v95_v55, %v71_v54  ;;  %v94_v1 = vld [vmem:[%s2142_s1 + $0x290] sm:$0xff]  ;;  %v117_v2 = vld [vmem:[%s2142_s1 + $0x348] sm:$0xff] }
  0x1f   :  { %1229 = vmatprep.subr.bf16.mxu1 %v1228_v23  ;;  %v141_v4 = vld [vmem:[%s2142_s1 + $0x408] sm:$0xff]  ;;  %v119_v5 = vld [vmem:[%s2142_s1 + $0x358] sm:$0xff]  ;;  %v1242_v7 = vpack.c.bf16 %v92_v61, %v68_v60  ;;  %v1258_v8 = vpack.c.bf16 %v94_v1, %v70_v62  ;;  %v116_v10 = vld [vmem:[%s2142_s1 + $0x340] sm:$0xff] }
  0x20   :  { %v143_v6 = vld [vmem:[%s2142_s1 + $0x418] sm:$0xff]  ;;  %v1244_v9 = vpack.c.bf16 %v141_v4, %v117_v2  ;;  %v140_v11 = vld [vmem:[%s2142_s1 + $0x400] sm:$0xff]  ;;  %v118_v12 = vld [vmem:[%s2142_s1 + $0x350] sm:$0xff] }
  0x21   :  { %1215 = vmatpush1.bf16.msra.mxu0 %v1214_v29  ;;  %v1260_v13 = vpack.c.bf16 %v143_v6, %v119_v5  ;;  %v142_v14 = vld [vmem:[%s2142_s1 + $0x410] sm:$0xff]  ;;  %v165_v15 = vld [vmem:[%s2142_s1 + $0x4c8] sm:$0xff]  ;;  %v167_v17 = vld [vmem:[%s2142_s1 + $0x4d8] sm:$0xff]  ;;  %v1246_v19 = vpack.c.bf16 %v140_v11, %v116_v10 }
  0x22   :  { %1231 = vmatpush1.bf16.msra.mxu1 %v1230_v30  ;;  %1217 = vmatprep.subr.bf16.mxu0 %v1216_v31  ;;  %v189_v16 = vld [vmem:[%s2142_s1 + $0x588] sm:$0xff]  ;;  %v191_v18 = vld [vmem:[%s2142_s1 + $0x598] sm:$0xff]  ;;  %v1262_v20 = vpack.c.bf16 %v142_v14, %v118_v12  ;;  %v164_v22 = vld [vmem:[%s2142_s1 + $0x4c0] sm:$0xff] }
  0x23   :  { %1233 = vmatprep.subr.bf16.mxu1 %v1232_v34  ;;  %v1248_v21 = vpack.c.bf16 %v189_v16, %v165_v15  ;;  %v188_v23 = vld [vmem:[%s2142_s1 + $0x580] sm:$0xff]  ;;  %v1264_v24 = vpack.c.bf16 %v191_v18, %v167_v17  ;;  %v166_v25 = vld [vmem:[%s2142_s1 + $0x4d0] sm:$0xff]  ;;  %v213_v29 = vld [vmem:[%s2142_s1 + $0x648] sm:$0xff] }
  0x24   :  { %v190_v26 = vld [vmem:[%s2142_s1 + $0x590] sm:$0xff]  ;;  %v1250_v27 = vpack.c.bf16 %v188_v23, %v164_v22  ;;  %v215_v30 = vld [vmem:[%s2142_s1 + $0x658] sm:$0xff]  ;;  %v25_v31 = vld [vmem:[%s2142_s1 + $0x68] sm:$0xff] }
  0x25   :  { %1219 = vmatpush1.bf16.msra.mxu0 %v1218_v37  ;;  %v1266_v28 = vpack.c.bf16 %v190_v26, %v166_v25  ;;  %v212_v32 = vld [vmem:[%s2142_s1 + $0x640] sm:$0xff]  ;;  %v49_v33 = vld [vmem:[%s2142_s1 + $0x128] sm:$0xff]  ;;  %v27_v34 = vld [vmem:[%s2142_s1 + $0x78] sm:$0xff] }
  0x26   :  { %1235 = vmatpush1.bf16.msra.mxu1 %v1234_v38  ;;  %390 = vmatprep.subr.mxu0 %v209_v39  ;;  %v51_v35 = vld [vmem:[%s2142_s1 + $0x138] sm:$0xff]  ;;  %v24_v36 = vld [vmem:[%s2142_s1 + $0x60] sm:$0xff]  ;;  %v26_v38 = vld [vmem:[%s2142_s1 + $0x70] sm:$0xff]  ;;  %v1268_v43 = vpack.c.bf16 %v49_v33, %v25_v31 }
  0x27   :  { %461 = vmatprep.subr.mxu1 %v211_v40  ;;  %v48_v37 = vld [vmem:[%s2142_s1 + $0x120] sm:$0xff]  ;;  %v50_v39 = vld [vmem:[%s2142_s1 + $0x130] sm:$0xff]  ;;  %v73_v40 = vld [vmem:[%s2142_s1 + $0x1e8] sm:$0xff]  ;;  %v1284_v46 = vpack.c.bf16 %v51_v35, %v27_v34 }
  0x28   :  { %v97_v41 = vld [vmem:[%s2142_s1 + $0x2a8] sm:$0xff]  ;;  %v75_v44 = vld [vmem:[%s2142_s1 + $0x1f8] sm:$0xff]  ;;  %v1270_v47 = vpack.c.bf16 %v48_v37, %v24_v36  ;;  %v1286_v48 = vpack.c.bf16 %v50_v39, %v26_v38  ;;  %v72_v50 = vld [vmem:[%s2142_s1 + $0x1e0] sm:$0xff] }
  0x29   :  { %391 = vmatpush1.msra.mxu0 %v208_v42  ;;  %v214_v42 = vld [vmem:[%s2142_s1 + $0x650] sm:$0xff]  ;;  %v99_v45 = vld [vmem:[%s2142_s1 + $0x2b8] sm:$0xff]  ;;  %v1272_v49 = vpack.c.bf16 %v97_v41, %v73_v40  ;;  %v96_v51 = vld [vmem:[%s2142_s1 + $0x2a0] sm:$0xff] }
  0x2a   :  { %462 = vmatpush1.msra.mxu1 %v210_v52  ;;  %1162 = vmatmul.mubr.msk.f32.vlgmr.msra.gmra.mrb[2].mxu0 %vm228_vm0, %v1524_v63  ;;  %v74_v52 = vld [vmem:[%s2142_s1 + $0x1f0] sm:$0xff]  ;;  %v121_v55 = vld [vmem:[%s2142_s1 + $0x368] sm:$0xff]  ;;  %v120_v62 = vld [vmem:[%s2142_s1 + $0x360] sm:$0xff] }
  0x2b   :  { %1163 = vmatmul.mubr.msk.f32.vlgmr.msra.gmra.mrb[2].mxu1 %vm228_vm0, %v1524_v63  ;;  %1237 = vmatprep.subr.bf16.mxu0 %v1236_v53  ;;  %v1288_v53 = vpack.c.bf16 %v99_v45, %v75_v44  ;;  %v98_v54 = vld [vmem:[%s2142_s1 + $0x2b0] sm:$0xff]  ;;  %v169_v5 = vld [vmem:[%s2142_s1 + $0x4e8] sm:$0xff]  ;;  %v168_v12 = vld [vmem:[%s2142_s1 + $0x4e0] sm:$0xff] }
  0x2c   :  { %1253 = vmatprep.subr.bf16.mxu1 %v1252_v56  ;;  %1239 = vmatpush1.bf16.msra.mxu0 %v1238_v57  ;;  %v145_v56 = vld [vmem:[%s2142_s1 + $0x428] sm:$0xff]  ;;  %v123_v57 = vld [vmem:[%s2142_s1 + $0x378] sm:$0xff]  ;;  %v1290_v60 = vpack.c.bf16 %v98_v54, %v74_v52  ;;  %v122_v1 = vld [vmem:[%s2142_s1 + $0x370] sm:$0xff] }
  0x2d   :  { %1255 = vmatpush1.bf16.msra.mxu1 %v1254_v58  ;;  %1241 = vmatprep.subr.bf16.mxu0 %v1240_v59  ;;  %v147_v58 = vld [vmem:[%s2142_s1 + $0x438] sm:$0xff]  ;;  %v1274_v59 = vpack.c.bf16 %v96_v51, %v72_v50  ;;  %v1276_v61 = vpack.c.bf16 %v145_v56, %v121_v55  ;;  %v146_v4 = vld [vmem:[%s2142_s1 + $0x430] sm:$0xff]  ;;  %v193_v6 = vld [vmem:[%s2142_s1 + $0x5a8] sm:$0xff] }
  0x2e   :  { %1257 = vmatprep.subr.bf16.mxu1 %v1256_v0  ;;  %580 = vmatprep.mubr.f32.mxu0 %v1365_v3  ;;  %v144_v0 = vld [vmem:[%s2142_s1 + $0x420] sm:$0xff]  ;;  %v1292_v2 = vpack.c.bf16 %v147_v58, %v123_v57  ;;  %v1294_v10 = vpack.c.bf16 %v146_v4, %v122_v1  ;;  %v1280_v11 = vpack.c.bf16 %v193_v6, %v169_v5  ;;  %v170_v15 = vld [vmem:[%s2142_s1 + $0x4f0] sm:$0xff]  ;;  %v53_v23 = vld [vmem:[%s2142_s1 + $0x148] sm:$0xff] }
  0x2f   :  { %651 = vmatprep.mubr.f32.mxu1 %v1365_v3  ;;  %v194_v16 = vld [vmem:[%s2142_s1 + $0x5b0] sm:$0xff]  ;;  %v216_v22 = vld [vmem:[%s2142_s1 + $0x660] sm:$0xff]  ;;  %v55_v25 = vld [vmem:[%s2142_s1 + $0x158] sm:$0xff] }
  0x30   :  { %1243 = vmatpush1.bf16.msra.mxu0 %v1242_v7  ;;  %v171_v7 = vld [vmem:[%s2142_s1 + $0x4f8] sm:$0xff]  ;;  %v1298_v18 = vpack.c.bf16 %v194_v16, %v170_v15  ;;  %v28_v26 = vld [vmem:[%s2142_s1 + $0x80] sm:$0xff]  ;;  %v101_v31 = vld [vmem:[%s2142_s1 + $0x2c8] sm:$0xff] }
  0x31   :  { %1259 = vmatpush1.bf16.msra.mxu1 %v1258_v8  ;;  %1245 = vmatprep.subr.bf16.mxu0 %v1244_v9  ;;  %v195_v8 = vld [vmem:[%s2142_s1 + $0x5b8] sm:$0xff]  ;;  %v1278_v9 = vpack.c.bf16 %v144_v0, %v120_v62  ;;  %v76_v40 = vld [vmem:[%s2142_s1 + $0x200] sm:$0xff]  ;;  %v102_v44 = vld [vmem:[%s2142_s1 + $0x2d0] sm:$0xff] }
  0x32   :  { %1261 = vmatprep.subr.bf16.mxu1 %v1260_v13  ;;  %v192_v13 = vld [vmem:[%s2142_s1 + $0x5a0] sm:$0xff]  ;;  %v1296_v14 = vpack.c.bf16 %v195_v8, %v171_v7  ;;  %v79_v34 = vld [vmem:[%s2142_s1 + $0x218] sm:$0xff]  ;;  %v125_v45 = vld [vmem:[%s2142_s1 + $0x388] sm:$0xff] }
  0x33   :  { %v1282_v17 = vpack.c.bf16 %v192_v13, %v168_v12  ;;  %v103_v35 = vld [vmem:[%s2142_s1 + $0x2d8] sm:$0xff]  ;;  %v100_v41 = vld [vmem:[%s2142_s1 + $0x2c0] sm:$0xff]  ;;  %v126_v54 = vld [vmem:[%s2142_s1 + $0x390] sm:$0xff] }
  0x34   :  { %1247 = vmatpush1.bf16.msra.mxu0 %v1246_v19  ;;  %v217_v19 = vld [vmem:[%s2142_s1 + $0x668] sm:$0xff]  ;;  %v124_v52 = vld [vmem:[%s2142_s1 + $0x380] sm:$0xff]  ;;  %v150_v56 = vld [vmem:[%s2142_s1 + $0x450] sm:$0xff] }
  0x35   :  { %1263 = vmatpush1.bf16.msra.mxu1 %v1262_v20  ;;  %1249 = vmatprep.subr.bf16.mxu0 %v1248_v21  ;;  %v219_v20 = vld [vmem:[%s2142_s1 + $0x678] sm:$0xff]  ;;  %v29_v21 = vld [vmem:[%s2142_s1 + $0x88] sm:$0xff]  ;;  %v1326_v62 = vpack.c.bf16 %v150_v56, %v126_v54  ;;  %v172_v1 = vld [vmem:[%s2142_s1 + $0x500] sm:$0xff] }
  0x36   :  { %1265 = vmatprep.subr.bf16.mxu1 %v1264_v24  ;;  %v31_v24 = vld [vmem:[%s2142_s1 + $0x98] sm:$0xff]  ;;  %v1300_v33 = vpack.c.bf16 %v53_v23, %v29_v21  ;;  %v173_v57 = vld [vmem:[%s2142_s1 + $0x508] sm:$0xff]  ;;  %v174_v5 = vld [vmem:[%s2142_s1 + $0x510] sm:$0xff] }
  0x37   :  { %v1316_v36 = vpack.c.bf16 %v55_v25, %v31_v24  ;;  %v197_v58 = vld [vmem:[%s2142_s1 + $0x5c8] sm:$0xff]  ;;  %v198_v6 = vld [vmem:[%s2142_s1 + $0x5d0] sm:$0xff]  ;;  %v220_v12 = vld [vmem:[%s2142_s1 + $0x680] sm:$0xff] }
  0x38   :  { %1251 = vmatpush1.bf16.msra.mxu0 %v1250_v27  ;;  %v52_v27 = vld [vmem:[%s2142_s1 + $0x140] sm:$0xff]  ;;  %v1312_v0 = vpack.c.bf16 %v197_v58, %v173_v57  ;;  %v1330_v8 = vpack.c.bf16 %v198_v6, %v174_v5  ;;  %v57_v13 = vld [vmem:[%s2142_s1 + $0x168] sm:$0xff]  ;;  %v59_v15 = vld [vmem:[%s2142_s1 + $0x178] sm:$0xff] }
  0x39   :  { %1267 = vmatpush1.bf16.msra.mxu1 %v1266_v28  ;;  %532 = vmatprep.subr.mxu0 %v213_v29  ;;  %v30_v28 = vld [vmem:[%s2142_s1 + $0x90] sm:$0xff]  ;;  %v1302_v37 = vpack.c.bf16 %v52_v27, %v28_v26  ;;  %v32_v16 = vld [vmem:[%s2142_s1 + $0xa0] sm:$0xff]  ;;  %v105_v21 = vld [vmem:[%s2142_s1 + $0x2e8] sm:$0xff] }
  0x3a   :  { %603 = vmatprep.subr.mxu1 %v215_v30  ;;  %v54_v29 = vld [vmem:[%s2142_s1 + $0x150] sm:$0xff]  ;;  %v77_v30 = vld [vmem:[%s2142_s1 + $0x208] sm:$0xff]  ;;  %v83_v24 = vld [vmem:[%s2142_s1 + $0x238] sm:$0xff] }
  0x3b   :  { %v1318_v38 = vpack.c.bf16 %v54_v29, %v30_v28  ;;  %v1304_v39 = vpack.c.bf16 %v101_v31, %v77_v30  ;;  %v107_v25 = vld [vmem:[%s2142_s1 + $0x2f8] sm:$0xff]  ;;  %v80_v30 = vld [vmem:[%s2142_s1 + $0x220] sm:$0xff]  ;;  %v202_v57 = vld [vmem:[%s2142_s1 + $0x5f0] sm:$0xff] }
  0x3c   :  { %533 = vmatpush1.msra.mxu0 %v212_v32  ;;  %v218_v32 = vld [vmem:[%s2142_s1 + $0x670] sm:$0xff]  ;;  %v104_v31 = vld [vmem:[%s2142_s1 + $0x2e0] sm:$0xff] }
  0x3d   :  { %604 = vmatpush1.msra.mxu1 %v214_v42  ;;  %1164 = vmatmul.mubr.msk.f32.vlgmr.msra.gmra.mrb[4].mxu0 %vm228_vm0, %v1524_v63  ;;  %v78_v42 = vld [vmem:[%s2142_s1 + $0x210] sm:$0xff]  ;;  %v176_v54 = vld [vmem:[%s2142_s1 + $0x520] sm:$0xff] }
  0x3e   :  { %1165 = vmatmul.mubr.msk.f32.vlgmr.msra.gmra.mrb[4].mxu1 %vm228_vm0, %v1524_v63  ;;  %1269 = vmatprep.subr.bf16.mxu0 %v1268_v43  ;;  %v1320_v43 = vpack.c.bf16 %v103_v35, %v79_v34  ;;  %v1322_v50 = vpack.c.bf16 %v102_v44, %v78_v42  ;;  %v106_v34 = vld [vmem:[%s2142_s1 + $0x2f0] sm:$0xff]  ;;  %v129_v35 = vld [vmem:[%s2142_s1 + $0x3a8] sm:$0xff]  ;;  %v128_v42 = vld [vmem:[%s2142_s1 + $0x3a0] sm:$0xff] }
  0x3f   :  { %1285 = vmatprep.subr.bf16.mxu1 %v1284_v46  ;;  %1271 = vmatpush1.bf16.msra.mxu0 %v1270_v47  ;;  %v149_v46 = vld [vmem:[%s2142_s1 + $0x448] sm:$0xff]  ;;  %v127_v47 = vld [vmem:[%s2142_s1 + $0x398] sm:$0xff]  ;;  %v130_v44 = vld [vmem:[%s2142_s1 + $0x3b0] sm:$0xff] }
  0x40   :  { %1287 = vmatpush1.bf16.msra.mxu1 %v1286_v48  ;;  %1273 = vmatprep.subr.bf16.mxu0 %v1272_v49  ;;  %v151_v48 = vld [vmem:[%s2142_s1 + $0x458] sm:$0xff]  ;;  %v1306_v49 = vpack.c.bf16 %v100_v41, %v76_v40  ;;  %v1308_v51 = vpack.c.bf16 %v149_v46, %v125_v45  ;;  %v154_v46 = vld [vmem:[%s2142_s1 + $0x470] sm:$0xff] }
  0x41   :  { %1289 = vmatprep.subr.bf16.mxu1 %v1288_v53  ;;  %722 = vmatprep.mubr.f32.mxu0 %v1365_v3  ;;  %v148_v53 = vld [vmem:[%s2142_s1 + $0x440] sm:$0xff]  ;;  %v1324_v55 = vpack.c.bf16 %v151_v48, %v127_v47  ;;  %v177_v47 = vld [vmem:[%s2142_s1 + $0x528] sm:$0xff] }
  0x42   :  { %793 = vmatprep.mubr.f32.mxu1 %v1365_v3  ;;  %v201_v48 = vld [vmem:[%s2142_s1 + $0x5e8] sm:$0xff] }
  0x43   :  { %1275 = vmatpush1.bf16.msra.mxu0 %v1274_v59  ;;  %v175_v59 = vld [vmem:[%s2142_s1 + $0x518] sm:$0xff] }
  0x44   :  { %1291 = vmatpush1.bf16.msra.mxu1 %v1290_v60  ;;  %1277 = vmatprep.subr.bf16.mxu0 %v1276_v61  ;;  %v199_v60 = vld [vmem:[%s2142_s1 + $0x5d8] sm:$0xff]  ;;  %v1310_v61 = vpack.c.bf16 %v148_v53, %v124_v52  ;;  %v1358_v52 = vpack.c.bf16 %v154_v46, %v130_v44  ;;  %v1344_v53 = vpack.c.bf16 %v201_v48, %v177_v47 }
  0x45   :  { %1293 = vmatprep.subr.bf16.mxu1 %v1292_v2  ;;  %v196_v2 = vld [vmem:[%s2142_s1 + $0x5c0] sm:$0xff]  ;;  %v1328_v4 = vpack.c.bf16 %v199_v60, %v175_v59  ;;  %v225_v60 = vld [vmem:[%s2142_s1 + $0x6a8] sm:$0xff] }
  0x46   :  { %v1314_v7 = vpack.c.bf16 %v196_v2, %v172_v1 }
  0x47   :  { %1279 = vmatpush1.bf16.msra.mxu0 %v1278_v9  ;;  %v221_v9 = vld [vmem:[%s2142_s1 + $0x688] sm:$0xff] }
  0x48   :  { %1295 = vmatpush1.bf16.msra.mxu1 %v1294_v10  ;;  %1281 = vmatprep.subr.bf16.mxu0 %v1280_v11  ;;  %v223_v10 = vld [vmem:[%s2142_s1 + $0x698] sm:$0xff]  ;;  %v33_v11 = vld [vmem:[%s2142_s1 + $0xa8] sm:$0xff] }
  0x49   :  { %1297 = vmatprep.subr.bf16.mxu1 %v1296_v14  ;;  %v35_v14 = vld [vmem:[%s2142_s1 + $0xb8] sm:$0xff]  ;;  %v1332_v23 = vpack.c.bf16 %v57_v13, %v33_v11 }
  0x4a   :  { %v1348_v26 = vpack.c.bf16 %v59_v15, %v35_v14 }
  0x4b   :  { %1283 = vmatpush1.bf16.msra.mxu0 %v1282_v17  ;;  %v56_v17 = vld [vmem:[%s2142_s1 + $0x160] sm:$0xff] }
  0x4c   :  { %1299 = vmatpush1.bf16.msra.mxu1 %v1298_v18  ;;  %674 = vmatprep.subr.mxu0 %v217_v19  ;;  %v34_v18 = vld [vmem:[%s2142_s1 + $0xb0] sm:$0xff]  ;;  %v1334_v27 = vpack.c.bf16 %v56_v17, %v32_v16 }
  0x4d   :  { %745 = vmatprep.subr.mxu1 %v219_v20  ;;  %v58_v19 = vld [vmem:[%s2142_s1 + $0x170] sm:$0xff]  ;;  %v81_v20 = vld [vmem:[%s2142_s1 + $0x228] sm:$0xff] }
  0x4e   :  { %v1350_v28 = vpack.c.bf16 %v58_v19, %v34_v18  ;;  %v1336_v29 = vpack.c.bf16 %v105_v21, %v81_v20 }
  0x4f   :  { %675 = vmatpush1.msra.mxu0 %v216_v22  ;;  %v222_v22 = vld [vmem:[%s2142_s1 + $0x690] sm:$0xff] }
  0x50   :  { %746 = vmatpush1.msra.mxu1 %v218_v32  ;;  %1166 = vmatmul.mubr.msk.f32.vlgmr.msra.gmra.mrb[6].mxu0 %vm228_vm0, %v1524_v63  ;;  %v82_v32 = vld [vmem:[%s2142_s1 + $0x230] sm:$0xff] }
  0x51   :  { %1167 = vmatmul.mubr.msk.f32.vlgmr.msra.gmra.mrb[6].mxu1 %vm228_vm0, %v1524_v63  ;;  %1301 = vmatprep.subr.bf16.mxu0 %v1300_v33  ;;  %v1352_v33 = vpack.c.bf16 %v107_v25, %v83_v24  ;;  %v1354_v40 = vpack.c.bf16 %v106_v34, %v82_v32 }
  0x52   :  { %1317 = vmatprep.subr.bf16.mxu1 %v1316_v36  ;;  %1303 = vmatpush1.bf16.msra.mxu0 %v1302_v37  ;;  %v153_v36 = vld [vmem:[%s2142_s1 + $0x468] sm:$0xff]  ;;  %v131_v37 = vld [vmem:[%s2142_s1 + $0x3b8] sm:$0xff] }
  0x53   :  { %1319 = vmatpush1.bf16.msra.mxu1 %v1318_v38  ;;  %1305 = vmatprep.subr.bf16.mxu0 %v1304_v39  ;;  %v155_v38 = vld [vmem:[%s2142_s1 + $0x478] sm:$0xff]  ;;  %v1338_v39 = vpack.c.bf16 %v104_v31, %v80_v30  ;;  %v1340_v41 = vpack.c.bf16 %v153_v36, %v129_v35 }
  0x54   :  { %1321 = vmatprep.subr.bf16.mxu1 %v1320_v43  ;;  %864 = vmatprep.mubr.f32.mxu0 %v1365_v3  ;;  %v152_v43 = vld [vmem:[%s2142_s1 + $0x460] sm:$0xff]  ;;  %v1356_v45 = vpack.c.bf16 %v155_v38, %v131_v37 }
  0x55   :  { %935 = vmatprep.mubr.f32.mxu1 %v1365_v3 }
  0x56   :  { %1307 = vmatpush1.bf16.msra.mxu0 %v1306_v49  ;;  %v179_v49 = vld [vmem:[%s2142_s1 + $0x538] sm:$0xff] }
  0x57   :  { %1323 = vmatpush1.bf16.msra.mxu1 %v1322_v50  ;;  %1309 = vmatprep.subr.bf16.mxu0 %v1308_v51  ;;  %v203_v50 = vld [vmem:[%s2142_s1 + $0x5f8] sm:$0xff]  ;;  %v1342_v51 = vpack.c.bf16 %v152_v43, %v128_v42 }
  0x58   :  { %1325 = vmatprep.subr.bf16.mxu1 %v1324_v55  ;;  %v200_v55 = vld [vmem:[%s2142_s1 + $0x5e0] sm:$0xff]  ;;  %v1360_v56 = vpack.c.bf16 %v203_v50, %v179_v49 }
  0x59   :  { %v1346_v58 = vpack.c.bf16 %v200_v55, %v176_v54 }
  0x5a   :  { %1311 = vmatpush1.bf16.msra.mxu0 %v1310_v61  ;;  %v227_v61 = vld [vmem:[%s2142_s1 + $0x6b8] sm:$0xff] }
  0x5b   :  { %1327 = vmatpush1.bf16.msra.mxu1 %v1326_v62  ;;  %1313 = vmatprep.subr.bf16.mxu0 %v1312_v0  ;;  %v224_v62 = vld [vmem:[%s2142_s1 + $0x6a0] sm:$0xff]  ;;  %v226_v0 = vld [vmem:[%s2142_s1 + $0x6b0] sm:$0xff] }
  0x5c   :  { %1329 = vmatprep.subr.bf16.mxu1 %v1328_v4 }
  0x5e   :  { %1315 = vmatpush1.bf16.msra.mxu0 %v1314_v7 }
  0x5f   :  { %1331 = vmatpush1.bf16.msra.mxu1 %v1330_v8  ;;  %816 = vmatprep.subr.mxu0 %v221_v9 }
  0x60   :  { %887 = vmatprep.subr.mxu1 %v223_v10 }
  0x62   :  { %817 = vmatpush1.msra.mxu0 %v220_v12 }
  0x63   :  { %888 = vmatpush1.msra.mxu1 %v222_v22  ;;  %1168 = vmatmul.mubr.msk.f32.vlgmr.msra.gmra.mrb[8].mxu0 %vm228_vm0, %v1524_v63 }
  0x64   :  { %1169 = vmatmul.mubr.msk.f32.vlgmr.msra.gmra.mrb[8].mxu1 %vm228_vm0, %v1524_v63  ;;  %1333 = vmatprep.subr.bf16.mxu0 %v1332_v23 }
  0x65   :  { %1349 = vmatprep.subr.bf16.mxu1 %v1348_v26  ;;  %1335 = vmatpush1.bf16.msra.mxu0 %v1334_v27 }
  0x66   :  { %1351 = vmatpush1.bf16.msra.mxu1 %v1350_v28  ;;  %1337 = vmatprep.subr.bf16.mxu0 %v1336_v29 }
  0x67   :  { %1353 = vmatprep.subr.bf16.mxu1 %v1352_v33  ;;  %1006 = vmatprep.mubr.f32.mxu0 %v1365_v3 }
  0x68   :  { %1077 = vmatprep.mubr.f32.mxu1 %v1365_v3  ;;  %v178_v3 = vld [vmem:[%s2142_s1 + $0x530] sm:$0xff] }
  0x69   :  { %1339 = vmatpush1.bf16.msra.mxu0 %v1338_v39  ;;  %v1362_v59 = vpack.c.bf16 %v202_v57, %v178_v3 }
  0x6a   :  { %1355 = vmatpush1.bf16.msra.mxu1 %v1354_v40  ;;  %1341 = vmatprep.subr.bf16.mxu0 %v1340_v41 }
  0x6b   :  { %1357 = vmatprep.subr.bf16.mxu1 %v1356_v45 }
  0x6d   :  { %1343 = vmatpush1.bf16.msra.mxu0 %v1342_v51 }
  0x6e   :  { %1359 = vmatpush1.bf16.msra.mxu1 %v1358_v52  ;;  %1345 = vmatprep.subr.bf16.mxu0 %v1344_v53 }
  0x6f   :  { %1361 = vmatprep.subr.bf16.mxu1 %v1360_v56 }
  0x71   :  { %1347 = vmatpush1.bf16.msra.mxu0 %v1346_v58 }
  0x72   :  { %1363 = vmatpush1.bf16.msra.mxu1 %v1362_v59  ;;  %958 = vmatprep.subr.mxu0 %v225_v60 }
  0x73   :  { %1029 = vmatprep.subr.mxu1 %v227_v61 }
  0x75   :  { %959 = vmatpush1.msra.mxu0 %v224_v62 }
  0x76   :  { %1030 = vmatpush1.msra.mxu1 %v226_v0  ;;  %1170 = vmatmul.mubr.msk.f32.vlgmr.msra.gmra.mrb[10].mxu0 %vm228_vm0, %v1524_v63 }
  0x77   :  { %1171 = vmatmul.mubr.msk.f32.vlgmr.msra.gmra.mrb[10].mxu1 %vm228_vm0, %v1524_v63 }
  0xea   :  { %v298_v1 = vpop.f32.mrb[0].mxu0 }
  0xeb   :  { %v1084_v2 = vmul.f32 0.2, %v298_v1  ;;  %v369_v4 = vpop.f32.mrb[0].mxu1  ;;  %v300_v5 = vpop.f32.mrb[1].mxu0 }
  0xec   :  { %v1086_v6 = vmul.f32 0.2, %v369_v4  ;;  %v1085_v7 = vmul.f32 0.2, %v300_v5  ;;  %v371_v8 = vpop.f32.mrb[1].mxu1 }
  0xed   :  { %v1108_v9 = vmax.f32 %v298_v1, %v1084_v2  ;;  %v1087_v10 = vmul.f32 0.2, %v371_v8 }
  0xee   :  { %v1110_v11 = vmax.f32 %v369_v4, %v1086_v6  ;;  %v1109_v12 = vmax.f32 %v300_v5, %v1085_v7 }
  0xef   :  { %1132 = vst [vmem:[%s2144_s2] sm:$0xff] %v1108_v9  ;;  %v1111_v13 = vmax.f32 %v371_v8, %v1087_v10 }
  0xf0   :  { %1134 = vst [vmem:[%s2144_s2 + $0x10] sm:$0xff] %v1110_v11  ;;  %1133 = vst [vmem:[%s2144_s2 + $0x8] sm:$0xff] %v1109_v12 }
  0xf1   :  { %1135 = vst [vmem:[%s2144_s2 + $0x18] sm:$0xff] %v1111_v13 }
  0xfd   :  { %v440_v63 = vpop.f32.mrb[2].mxu0 }
  0xfe   :  { %v1088_v14 = vmul.f32 0.2, %v440_v63  ;;  %v511_v15 = vpop.f32.mrb[2].mxu1  ;;  %v442_v16 = vpop.f32.mrb[3].mxu0 }
  0xff   :  { %v1090_v17 = vmul.f32 0.2, %v511_v15  ;;  %v1089_v18 = vmul.f32 0.2, %v442_v16  ;;  %v513_v19 = vpop.f32.mrb[3].mxu1 }
 0x100   :  { %v1112_v20 = vmax.f32 %v440_v63, %v1088_v14  ;;  %v1091_v21 = vmul.f32 0.2, %v513_v19 }
 0x101   :  { %v1114_v22 = vmax.f32 %v511_v15, %v1090_v17  ;;  %v1113_v23 = vmax.f32 %v442_v16, %v1089_v18 }
 0x102   :  { %1136 = vst [vmem:[%s2144_s2 + $0x20] sm:$0xff] %v1112_v20  ;;  %v1115_v24 = vmax.f32 %v513_v19, %v1091_v21 }
 0x103   :  { %1138 = vst [vmem:[%s2144_s2 + $0x30] sm:$0xff] %v1114_v22  ;;  %1137 = vst [vmem:[%s2144_s2 + $0x28] sm:$0xff] %v1113_v23 }
 0x104   :  { %1139 = vst [vmem:[%s2144_s2 + $0x38] sm:$0xff] %v1115_v24 }
 0x110   :  { %v582_v25 = vpop.f32.mrb[4].mxu0 }
 0x111   :  { %v1092_v26 = vmul.f32 0.2, %v582_v25  ;;  %v653_v27 = vpop.f32.mrb[4].mxu1  ;;  %v584_v28 = vpop.f32.mrb[5].mxu0 }
 0x112   :  { %v1094_v29 = vmul.f32 0.2, %v653_v27  ;;  %v1093_v30 = vmul.f32 0.2, %v584_v28  ;;  %v655_v31 = vpop.f32.mrb[5].mxu1 }
 0x113   :  { %v1116_v32 = vmax.f32 %v582_v25, %v1092_v26  ;;  %v1095_v33 = vmul.f32 0.2, %v655_v31 }
 0x114   :  { %v1118_v34 = vmax.f32 %v653_v27, %v1094_v29  ;;  %v1117_v35 = vmax.f32 %v584_v28, %v1093_v30 }
 0x115   :  { %1140 = vst [vmem:[%s2144_s2 + $0x40] sm:$0xff] %v1116_v32  ;;  %v1119_v36 = vmax.f32 %v655_v31, %v1095_v33 }
 0x116   :  { %1142 = vst [vmem:[%s2144_s2 + $0x50] sm:$0xff] %v1118_v34  ;;  %1141 = vst [vmem:[%s2144_s2 + $0x48] sm:$0xff] %v1117_v35 }
 0x117   :  { %1143 = vst [vmem:[%s2144_s2 + $0x58] sm:$0xff] %v1119_v36 }
 0x123   :  { %v724_v37 = vpop.f32.mrb[6].mxu0 }
 0x124   :  { %v1096_v38 = vmul.f32 0.2, %v724_v37  ;;  %v795_v39 = vpop.f32.mrb[6].mxu1  ;;  %v726_v40 = vpop.f32.mrb[7].mxu0 }
 0x125   :  { %v1098_v41 = vmul.f32 0.2, %v795_v39  ;;  %v1097_v42 = vmul.f32 0.2, %v726_v40  ;;  %v797_v43 = vpop.f32.mrb[7].mxu1 }
 0x126   :  { %v1120_v44 = vmax.f32 %v724_v37, %v1096_v38  ;;  %v1099_v45 = vmul.f32 0.2, %v797_v43 }
 0x127   :  { %v1122_v46 = vmax.f32 %v795_v39, %v1098_v41  ;;  %v1121_v47 = vmax.f32 %v726_v40, %v1097_v42 }
 0x128   :  { %1144 = vst [vmem:[%s2144_s2 + $0x60] sm:$0xff] %v1120_v44  ;;  %v1123_v48 = vmax.f32 %v797_v43, %v1099_v45 }
 0x129   :  { %1146 = vst [vmem:[%s2144_s2 + $0x70] sm:$0xff] %v1122_v46  ;;  %1145 = vst [vmem:[%s2144_s2 + $0x68] sm:$0xff] %v1121_v47 }
 0x12a   :  { %1147 = vst [vmem:[%s2144_s2 + $0x78] sm:$0xff] %v1123_v48 }
 0x136   :  { %v866_v49 = vpop.f32.mrb[8].mxu0 }
 0x137   :  { %v1100_v50 = vmul.f32 0.2, %v866_v49  ;;  %v937_v51 = vpop.f32.mrb[8].mxu1  ;;  %v868_v52 = vpop.f32.mrb[9].mxu0 }
 0x138   :  { %v1102_v53 = vmul.f32 0.2, %v937_v51  ;;  %v1101_v54 = vmul.f32 0.2, %v868_v52  ;;  %v939_v55 = vpop.f32.mrb[9].mxu1 }
 0x139   :  { %v1124_v56 = vmax.f32 %v866_v49, %v1100_v50  ;;  %v1103_v3 = vmul.f32 0.2, %v939_v55 }
 0x13a   :  { %v1126_v57 = vmax.f32 %v937_v51, %v1102_v53  ;;  %v1125_v58 = vmax.f32 %v868_v52, %v1101_v54 }
 0x13b   :  { %1148 = vst [vmem:[%s2144_s2 + $0x80] sm:$0xff] %v1124_v56  ;;  %v1127_v59 = vmax.f32 %v939_v55, %v1103_v3 }
 0x13c   :  { %1150 = vst [vmem:[%s2144_s2 + $0x90] sm:$0xff] %v1126_v57  ;;  %1149 = vst [vmem:[%s2144_s2 + $0x88] sm:$0xff] %v1125_v58 }
 0x13d   :  { %1151 = vst [vmem:[%s2144_s2 + $0x98] sm:$0xff] %v1127_v59 }
 0x149   :  { %v1008_v60 = vpop.f32.mrb[10].mxu0 }
 0x14a   :  { %v1104_v61 = vmul.f32 0.2, %v1008_v60  ;;  %v1079_v62 = vpop.f32.mrb[10].mxu1  ;;  %v1010_v0 = vpop.f32.mrb[11].mxu0 }
 0x14b   :  { %v1106_v1 = vmul.f32 0.2, %v1079_v62  ;;  %v1105_v2 = vmul.f32 0.2, %v1010_v0  ;;  %v1081_v4 = vpop.f32.mrb[11].mxu1 }
 0x14c   :  { %v1128_v5 = vmax.f32 %v1008_v60, %v1104_v61  ;;  %v1107_v6 = vmul.f32 0.2, %v1081_v4 }
 0x14d   :  { %v1130_v7 = vmax.f32 %v1079_v62, %v1106_v1  ;;  %v1129_v8 = vmax.f32 %v1010_v0, %v1105_v2 }
 0x14e   :  { %1152 = vst [vmem:[%s2144_s2 + $0xa0] sm:$0xff] %v1128_v5  ;;  %v1131_v9 = vmax.f32 %v1081_v4, %v1107_v6 }
 0x14f   :  { %1154 = vst [vmem:[%s2144_s2 + $0xb0] sm:$0xff] %v1130_v7  ;;  %1153 = vst [vmem:[%s2144_s2 + $0xa8] sm:$0xff] %v1129_v8 }
 0x150   :  { %1155 = vst [vmem:[%s2144_s2 + $0xb8] sm:$0xff] %v1131_v9 }

// kernel: fe_fwd.9
= control target key start
LH: loop header
LB: loop body
LE: loop exit
PB: predicated region body
PF: predicated region fallthrough
CT: control target
= control target key end

     0   :  { %v1317_v3 = vmov 0.0   ;;  %vm228_vm0 = vcmask 588800   ;;  %s2094_s1 = inlined_call_operand.vmem [shape: f32[1,72,3072], index: 1, kind: input, shape index: {}]   ;;  %s2095_s0 = inlined_call_operand.vmem [shape: f32[1,8,72], index: 0, kind: input, shape index: {}]   ;;  %s2096_s2 = inlined_call_operand.vmem [shape: f32[1,8,3072], index: 2, kind: output, shape index: {}]  }
   0x1   :  { %v13_v0 = vld [vmem:[%s2094_s1 + $0x8] sm:$0xff]  ;;  %v15_v2 = vld [vmem:[%s2094_s1 + $0x18] sm:$0xff]  ;;  %296 = vmatprep.mubr.f32.mxu0 %v1317_v3  ;;  %367 = vmatprep.mubr.f32.mxu1 %v1317_v3  ;;  %v12_v6 = vld [vmem:[%s2094_s1] sm:$0xff] }
   0x2   :  { %v37_v1 = vld [vmem:[%s2094_s1 + $0xc8] sm:$0xff]  ;;  %v39_v5 = vld [vmem:[%s2094_s1 + $0xd8] sm:$0xff]  ;;  %v36_v7 = vld [vmem:[%s2094_s1 + $0xc0] sm:$0xff] }
   0x3   :  { %v1124_v4 = vpack.c.bf16 %v37_v1, %v13_v0  ;;  %v1140_v8 = vpack.c.bf16 %v39_v5, %v15_v2  ;;  %v1126_v9 = vpack.c.bf16 %v36_v7, %v12_v6  ;;  %v14_v10 = vld [vmem:[%s2094_s1 + $0x10] sm:$0xff]  ;;  %v61_v12 = vld [vmem:[%s2094_s1 + $0x188] sm:$0xff]  ;;  %v63_v15 = vld [vmem:[%s2094_s1 + $0x198] sm:$0xff] }
   0x4   :  { %v38_v11 = vld [vmem:[%s2094_s1 + $0xd0] sm:$0xff]  ;;  %v85_v14 = vld [vmem:[%s2094_s1 + $0x248] sm:$0xff]  ;;  %v87_v16 = vld [vmem:[%s2094_s1 + $0x258] sm:$0xff] }
   0x5   :  { %1125 = vmatprep.subr.bf16.mxu0 %v1124_v4  ;;  %v1142_v13 = vpack.c.bf16 %v38_v11, %v14_v10  ;;  %1141 = vmatprep.subr.bf16.mxu1 %v1140_v8  ;;  %v1128_v17 = vpack.c.bf16 %v85_v14, %v61_v12  ;;  %v1144_v18 = vpack.c.bf16 %v87_v16, %v63_v15  ;;  %v60_v19 = vld [vmem:[%s2094_s1 + $0x180] sm:$0xff]  ;;  %v62_v21 = vld [vmem:[%s2094_s1 + $0x190] sm:$0xff]  ;;  %v109_v24 = vld [vmem:[%s2094_s1 + $0x308] sm:$0xff] }
   0x6   :  { %1127 = vmatpush1.bf16.msra.mxu0 %v1126_v9  ;;  %v84_v20 = vld [vmem:[%s2094_s1 + $0x240] sm:$0xff]  ;;  %v86_v23 = vld [vmem:[%s2094_s1 + $0x250] sm:$0xff]  ;;  %v133_v25 = vld [vmem:[%s2094_s1 + $0x3c8] sm:$0xff] }
   0x7   :  { %1143 = vmatpush1.bf16.msra.mxu1 %v1142_v13  ;;  %v1130_v22 = vpack.c.bf16 %v84_v20, %v60_v19  ;;  %1129 = vmatprep.subr.bf16.mxu0 %v1128_v17  ;;  %v1146_v26 = vpack.c.bf16 %v86_v23, %v62_v21  ;;  %v1132_v27 = vpack.c.bf16 %v133_v25, %v109_v24  ;;  %v111_v28 = vld [vmem:[%s2094_s1 + $0x318] sm:$0xff]  ;;  %v108_v30 = vld [vmem:[%s2094_s1 + $0x300] sm:$0xff]  ;;  %v110_v33 = vld [vmem:[%s2094_s1 + $0x310] sm:$0xff] }
   0x8   :  { %1145 = vmatprep.subr.bf16.mxu1 %v1144_v18  ;;  %v135_v29 = vld [vmem:[%s2094_s1 + $0x3d8] sm:$0xff]  ;;  %v132_v32 = vld [vmem:[%s2094_s1 + $0x3c0] sm:$0xff]  ;;  %v134_v34 = vld [vmem:[%s2094_s1 + $0x3d0] sm:$0xff] }
   0x9   :  { %v1148_v31 = vpack.c.bf16 %v135_v29, %v111_v28  ;;  %v1134_v35 = vpack.c.bf16 %v132_v32, %v108_v30  ;;  %v157_v36 = vld [vmem:[%s2094_s1 + $0x488] sm:$0xff]  ;;  %v159_v38 = vld [vmem:[%s2094_s1 + $0x498] sm:$0xff]  ;;  %v1150_v39 = vpack.c.bf16 %v134_v34, %v110_v33  ;;  %v156_v42 = vld [vmem:[%s2094_s1 + $0x480] sm:$0xff] }
   0xa   :  { %1131 = vmatpush1.bf16.msra.mxu0 %v1130_v22  ;;  %v181_v37 = vld [vmem:[%s2094_s1 + $0x548] sm:$0xff]  ;;  %v183_v41 = vld [vmem:[%s2094_s1 + $0x558] sm:$0xff]  ;;  %v180_v43 = vld [vmem:[%s2094_s1 + $0x540] sm:$0xff] }
   0xb   :  { %1147 = vmatpush1.bf16.msra.mxu1 %v1146_v26  ;;  %1133 = vmatprep.subr.bf16.mxu0 %v1132_v27  ;;  %v1136_v40 = vpack.c.bf16 %v181_v37, %v157_v36  ;;  %v1152_v44 = vpack.c.bf16 %v183_v41, %v159_v38  ;;  %v158_v45 = vld [vmem:[%s2094_s1 + $0x490] sm:$0xff]  ;;  %v1138_v47 = vpack.c.bf16 %v180_v43, %v156_v42  ;;  %v205_v49 = vld [vmem:[%s2094_s1 + $0x608] sm:$0xff]  ;;  %v207_v50 = vld [vmem:[%s2094_s1 + $0x618] sm:$0xff] }
   0xc   :  { %1149 = vmatprep.subr.bf16.mxu1 %v1148_v31  ;;  %v182_v46 = vld [vmem:[%s2094_s1 + $0x550] sm:$0xff]  ;;  %v17_v51 = vld [vmem:[%s2094_s1 + $0x28] sm:$0xff]  ;;  %v204_v52 = vld [vmem:[%s2094_s1 + $0x600] sm:$0xff] }
   0xd   :  { %v1154_v48 = vpack.c.bf16 %v182_v46, %v158_v45  ;;  %v41_v53 = vld [vmem:[%s2094_s1 + $0xe8] sm:$0xff]  ;;  %v19_v54 = vld [vmem:[%s2094_s1 + $0x38] sm:$0xff]  ;;  %v206_v56 = vld [vmem:[%s2094_s1 + $0x610] sm:$0xff] }
   0xe   :  { %1135 = vmatpush1.bf16.msra.mxu0 %v1134_v35  ;;  %v43_v55 = vld [vmem:[%s2094_s1 + $0xf8] sm:$0xff]  ;;  %v16_v57 = vld [vmem:[%s2094_s1 + $0x20] sm:$0xff]  ;;  %v18_v59 = vld [vmem:[%s2094_s1 + $0x30] sm:$0xff]  ;;  %v1156_v0 = vpack.c.bf16 %v41_v53, %v17_v51 }
   0xf   :  { %1151 = vmatpush1.bf16.msra.mxu1 %v1150_v39  ;;  %1137 = vmatprep.subr.bf16.mxu0 %v1136_v40  ;;  %v40_v58 = vld [vmem:[%s2094_s1 + $0xe0] sm:$0xff]  ;;  %v42_v60 = vld [vmem:[%s2094_s1 + $0xf0] sm:$0xff]  ;;  %v65_v61 = vld [vmem:[%s2094_s1 + $0x1a8] sm:$0xff]  ;;  %v1172_v4 = vpack.c.bf16 %v43_v55, %v19_v54 }
  0x10   :  { %1153 = vmatprep.subr.bf16.mxu1 %v1152_v44  ;;  %v89_v62 = vld [vmem:[%s2094_s1 + $0x268] sm:$0xff]  ;;  %v1476_v63 = vld [vmem:[%s2095_s0] sm:$0xff]  ;;  %v67_v1 = vld [vmem:[%s2094_s1 + $0x1b8] sm:$0xff]  ;;  %v1158_v5 = vpack.c.bf16 %v40_v58, %v16_v57  ;;  %v1174_v6 = vpack.c.bf16 %v42_v60, %v18_v59 }
  0x11   :  { %v91_v2 = vld [vmem:[%s2094_s1 + $0x278] sm:$0xff]  ;;  %v1160_v7 = vpack.c.bf16 %v89_v62, %v65_v61  ;;  %v64_v8 = vld [vmem:[%s2094_s1 + $0x1a0] sm:$0xff]  ;;  %v66_v10 = vld [vmem:[%s2094_s1 + $0x1b0] sm:$0xff] }
  0x12   :  { %1139 = vmatpush1.bf16.msra.mxu0 %v1138_v47  ;;  %v88_v9 = vld [vmem:[%s2094_s1 + $0x260] sm:$0xff]  ;;  %v1176_v11 = vpack.c.bf16 %v91_v2, %v67_v1  ;;  %v90_v12 = vld [vmem:[%s2094_s1 + $0x270] sm:$0xff]  ;;  %v113_v13 = vld [vmem:[%s2094_s1 + $0x328] sm:$0xff] }
  0x13   :  { %1155 = vmatpush1.bf16.msra.mxu1 %v1154_v48  ;;  %248 = vmatprep.subr.mxu0 %v205_v49  ;;  %v137_v14 = vld [vmem:[%s2094_s1 + $0x3e8] sm:$0xff]  ;;  %v115_v15 = vld [vmem:[%s2094_s1 + $0x338] sm:$0xff]  ;;  %v1162_v17 = vpack.c.bf16 %v88_v9, %v64_v8  ;;  %v1178_v18 = vpack.c.bf16 %v90_v12, %v66_v10  ;;  %v112_v20 = vld [vmem:[%s2094_s1 + $0x320] sm:$0xff] }
  0x14   :  { %319 = vmatprep.subr.mxu1 %v207_v50  ;;  %v139_v16 = vld [vmem:[%s2094_s1 + $0x3f8] sm:$0xff]  ;;  %v1164_v19 = vpack.c.bf16 %v137_v14, %v113_v13  ;;  %v136_v21 = vld [vmem:[%s2094_s1 + $0x3e0] sm:$0xff]  ;;  %v114_v22 = vld [vmem:[%s2094_s1 + $0x330] sm:$0xff] }
  0x15   :  { %v1180_v23 = vpack.c.bf16 %v139_v16, %v115_v15  ;;  %v138_v24 = vld [vmem:[%s2094_s1 + $0x3f0] sm:$0xff]  ;;  %v161_v25 = vld [vmem:[%s2094_s1 + $0x4a8] sm:$0xff]  ;;  %v163_v27 = vld [vmem:[%s2094_s1 + $0x4b8] sm:$0xff]  ;;  %v1166_v29 = vpack.c.bf16 %v136_v21, %v112_v20 }
  0x16   :  { %249 = vmatpush1.msra.mxu0 %v204_v52  ;;  %v185_v26 = vld [vmem:[%s2094_s1 + $0x568] sm:$0xff]  ;;  %v187_v28 = vld [vmem:[%s2094_s1 + $0x578] sm:$0xff]  ;;  %v1182_v30 = vpack.c.bf16 %v138_v24, %v114_v22  ;;  %v160_v32 = vld [vmem:[%s2094_s1 + $0x4a0] sm:$0xff] }
  0x17   :  { %320 = vmatpush1.msra.mxu1 %v206_v56  ;;  %1112 = vmatmul.mubr.msk.f32.vlgmr.msra.gmra.mrb[0].mxu0 %vm228_vm0, %v1476_v63  ;;  %v1168_v31 = vpack.c.bf16 %v185_v26, %v161_v25  ;;  %v184_v33 = vld [vmem:[%s2094_s1 + $0x560] sm:$0xff]  ;;  %v1184_v34 = vpack.c.bf16 %v187_v28, %v163_v27  ;;  %v162_v35 = vld [vmem:[%s2094_s1 + $0x4b0] sm:$0xff]  ;;  %v209_v39 = vld [vmem:[%s2094_s1 + $0x628] sm:$0xff] }
  0x18   :  { %1113 = vmatmul.mubr.msk.f32.vlgmr.msra.gmra.mrb[0].mxu1 %vm228_vm0, %v1476_v63  ;;  %1157 = vmatprep.subr.bf16.mxu0 %v1156_v0  ;;  %v186_v36 = vld [vmem:[%s2094_s1 + $0x570] sm:$0xff]  ;;  %v1170_v37 = vpack.c.bf16 %v184_v33, %v160_v32  ;;  %v211_v40 = vld [vmem:[%s2094_s1 + $0x638] sm:$0xff]  ;;  %v21_v41 = vld [vmem:[%s2094_s1 + $0x48] sm:$0xff] }
  0x19   :  { %1173 = vmatprep.subr.bf16.mxu1 %v1172_v4  ;;  %1159 = vmatpush1.bf16.msra.mxu0 %v1158_v5  ;;  %v1186_v38 = vpack.c.bf16 %v186_v36, %v162_v35  ;;  %v208_v42 = vld [vmem:[%s2094_s1 + $0x620] sm:$0xff]  ;;  %v45_v43 = vld [vmem:[%s2094_s1 + $0x108] sm:$0xff]  ;;  %v23_v44 = vld [vmem:[%s2094_s1 + $0x58] sm:$0xff] }
  0x1a   :  { %1175 = vmatpush1.bf16.msra.mxu1 %v1174_v6  ;;  %1161 = vmatprep.subr.bf16.mxu0 %v1160_v7  ;;  %v47_v45 = vld [vmem:[%s2094_s1 + $0x118] sm:$0xff]  ;;  %v20_v46 = vld [vmem:[%s2094_s1 + $0x40] sm:$0xff]  ;;  %v22_v48 = vld [vmem:[%s2094_s1 + $0x50] sm:$0xff]  ;;  %v1188_v53 = vpack.c.bf16 %v45_v43, %v21_v41 }
  0x1b   :  { %1177 = vmatprep.subr.bf16.mxu1 %v1176_v11  ;;  %438 = vmatprep.mubr.f32.mxu0 %v1317_v3  ;;  %v44_v47 = vld [vmem:[%s2094_s1 + $0x100] sm:$0xff]  ;;  %v46_v49 = vld [vmem:[%s2094_s1 + $0x110] sm:$0xff]  ;;  %v69_v50 = vld [vmem:[%s2094_s1 + $0x1c8] sm:$0xff]  ;;  %v1204_v56 = vpack.c.bf16 %v47_v45, %v23_v44 }
  0x1c   :  { %509 = vmatprep.mubr.f32.mxu1 %v1317_v3  ;;  %v93_v51 = vld [vmem:[%s2094_s1 + $0x288] sm:$0xff]  ;;  %v210_v52 = vld [vmem:[%s2094_s1 + $0x630] sm:$0xff]  ;;  %v71_v54 = vld [vmem:[%s2094_s1 + $0x1d8] sm:$0xff]  ;;  %v1190_v57 = vpack.c.bf16 %v44_v47, %v20_v46  ;;  %v1206_v58 = vpack.c.bf16 %v46_v49, %v22_v48 }
  0x1d   :  { %1163 = vmatpush1.bf16.msra.mxu0 %v1162_v17  ;;  %v95_v55 = vld [vmem:[%s2094_s1 + $0x298] sm:$0xff]  ;;  %v1192_v59 = vpack.c.bf16 %v93_v51, %v69_v50  ;;  %v68_v60 = vld [vmem:[%s2094_s1 + $0x1c0] sm:$0xff]  ;;  %v70_v62 = vld [vmem:[%s2094_s1 + $0x1d0] sm:$0xff] }
  0x1e   :  { %1179 = vmatpush1.bf16.msra.mxu1 %v1178_v18  ;;  %1165 = vmatprep.subr.bf16.mxu0 %v1164_v19  ;;  %v92_v61 = vld [vmem:[%s2094_s1 + $0x280] sm:$0xff]  ;;  %v1208_v0 = vpack.c.bf16 %v95_v55, %v71_v54  ;;  %v94_v1 = vld [vmem:[%s2094_s1 + $0x290] sm:$0xff]  ;;  %v117_v2 = vld [vmem:[%s2094_s1 + $0x348] sm:$0xff] }
  0x1f   :  { %1181 = vmatprep.subr.bf16.mxu1 %v1180_v23  ;;  %v141_v4 = vld [vmem:[%s2094_s1 + $0x408] sm:$0xff]  ;;  %v119_v5 = vld [vmem:[%s2094_s1 + $0x358] sm:$0xff]  ;;  %v1194_v7 = vpack.c.bf16 %v92_v61, %v68_v60  ;;  %v1210_v8 = vpack.c.bf16 %v94_v1, %v70_v62  ;;  %v116_v10 = vld [vmem:[%s2094_s1 + $0x340] sm:$0xff] }
  0x20   :  { %v143_v6 = vld [vmem:[%s2094_s1 + $0x418] sm:$0xff]  ;;  %v1196_v9 = vpack.c.bf16 %v141_v4, %v117_v2  ;;  %v140_v11 = vld [vmem:[%s2094_s1 + $0x400] sm:$0xff]  ;;  %v118_v12 = vld [vmem:[%s2094_s1 + $0x350] sm:$0xff] }
  0x21   :  { %1167 = vmatpush1.bf16.msra.mxu0 %v1166_v29  ;;  %v1212_v13 = vpack.c.bf16 %v143_v6, %v119_v5  ;;  %v142_v14 = vld [vmem:[%s2094_s1 + $0x410] sm:$0xff]  ;;  %v165_v15 = vld [vmem:[%s2094_s1 + $0x4c8] sm:$0xff]  ;;  %v167_v17 = vld [vmem:[%s2094_s1 + $0x4d8] sm:$0xff]  ;;  %v1198_v19 = vpack.c.bf16 %v140_v11, %v116_v10 }
  0x22   :  { %1183 = vmatpush1.bf16.msra.mxu1 %v1182_v30  ;;  %1169 = vmatprep.subr.bf16.mxu0 %v1168_v31  ;;  %v189_v16 = vld [vmem:[%s2094_s1 + $0x588] sm:$0xff]  ;;  %v191_v18 = vld [vmem:[%s2094_s1 + $0x598] sm:$0xff]  ;;  %v1214_v20 = vpack.c.bf16 %v142_v14, %v118_v12  ;;  %v164_v22 = vld [vmem:[%s2094_s1 + $0x4c0] sm:$0xff] }
  0x23   :  { %1185 = vmatprep.subr.bf16.mxu1 %v1184_v34  ;;  %v1200_v21 = vpack.c.bf16 %v189_v16, %v165_v15  ;;  %v188_v23 = vld [vmem:[%s2094_s1 + $0x580] sm:$0xff]  ;;  %v1216_v24 = vpack.c.bf16 %v191_v18, %v167_v17  ;;  %v166_v25 = vld [vmem:[%s2094_s1 + $0x4d0] sm:$0xff]  ;;  %v213_v29 = vld [vmem:[%s2094_s1 + $0x648] sm:$0xff] }
  0x24   :  { %v190_v26 = vld [vmem:[%s2094_s1 + $0x590] sm:$0xff]  ;;  %v1202_v27 = vpack.c.bf16 %v188_v23, %v164_v22  ;;  %v215_v30 = vld [vmem:[%s2094_s1 + $0x658] sm:$0xff]  ;;  %v25_v31 = vld [vmem:[%s2094_s1 + $0x68] sm:$0xff] }
  0x25   :  { %1171 = vmatpush1.bf16.msra.mxu0 %v1170_v37  ;;  %v1218_v28 = vpack.c.bf16 %v190_v26, %v166_v25  ;;  %v212_v32 = vld [vmem:[%s2094_s1 + $0x640] sm:$0xff]  ;;  %v49_v33 = vld [vmem:[%s2094_s1 + $0x128] sm:$0xff]  ;;  %v27_v34 = vld [vmem:[%s2094_s1 + $0x78] sm:$0xff] }
  0x26   :  { %1187 = vmatpush1.bf16.msra.mxu1 %v1186_v38  ;;  %390 = vmatprep.subr.mxu0 %v209_v39  ;;  %v51_v35 = vld [vmem:[%s2094_s1 + $0x138] sm:$0xff]  ;;  %v24_v36 = vld [vmem:[%s2094_s1 + $0x60] sm:$0xff]  ;;  %v26_v38 = vld [vmem:[%s2094_s1 + $0x70] sm:$0xff]  ;;  %v1220_v43 = vpack.c.bf16 %v49_v33, %v25_v31 }
  0x27   :  { %461 = vmatprep.subr.mxu1 %v211_v40  ;;  %v48_v37 = vld [vmem:[%s2094_s1 + $0x120] sm:$0xff]  ;;  %v50_v39 = vld [vmem:[%s2094_s1 + $0x130] sm:$0xff]  ;;  %v73_v40 = vld [vmem:[%s2094_s1 + $0x1e8] sm:$0xff]  ;;  %v1236_v46 = vpack.c.bf16 %v51_v35, %v27_v34 }
  0x28   :  { %v97_v41 = vld [vmem:[%s2094_s1 + $0x2a8] sm:$0xff]  ;;  %v75_v44 = vld [vmem:[%s2094_s1 + $0x1f8] sm:$0xff]  ;;  %v1222_v47 = vpack.c.bf16 %v48_v37, %v24_v36  ;;  %v1238_v48 = vpack.c.bf16 %v50_v39, %v26_v38  ;;  %v72_v50 = vld [vmem:[%s2094_s1 + $0x1e0] sm:$0xff] }
  0x29   :  { %391 = vmatpush1.msra.mxu0 %v208_v42  ;;  %v214_v42 = vld [vmem:[%s2094_s1 + $0x650] sm:$0xff]  ;;  %v99_v45 = vld [vmem:[%s2094_s1 + $0x2b8] sm:$0xff]  ;;  %v1224_v49 = vpack.c.bf16 %v97_v41, %v73_v40  ;;  %v96_v51 = vld [vmem:[%s2094_s1 + $0x2a0] sm:$0xff] }
  0x2a   :  { %462 = vmatpush1.msra.mxu1 %v210_v52  ;;  %1114 = vmatmul.mubr.msk.f32.vlgmr.msra.gmra.mrb[2].mxu0 %vm228_vm0, %v1476_v63  ;;  %v74_v52 = vld [vmem:[%s2094_s1 + $0x1f0] sm:$0xff]  ;;  %v121_v55 = vld [vmem:[%s2094_s1 + $0x368] sm:$0xff]  ;;  %v120_v62 = vld [vmem:[%s2094_s1 + $0x360] sm:$0xff] }
  0x2b   :  { %1115 = vmatmul.mubr.msk.f32.vlgmr.msra.gmra.mrb[2].mxu1 %vm228_vm0, %v1476_v63  ;;  %1189 = vmatprep.subr.bf16.mxu0 %v1188_v53  ;;  %v1240_v53 = vpack.c.bf16 %v99_v45, %v75_v44  ;;  %v98_v54 = vld [vmem:[%s2094_s1 + $0x2b0] sm:$0xff]  ;;  %v169_v5 = vld [vmem:[%s2094_s1 + $0x4e8] sm:$0xff]  ;;  %v168_v12 = vld [vmem:[%s2094_s1 + $0x4e0] sm:$0xff] }
  0x2c   :  { %1205 = vmatprep.subr.bf16.mxu1 %v1204_v56  ;;  %1191 = vmatpush1.bf16.msra.mxu0 %v1190_v57  ;;  %v145_v56 = vld [vmem:[%s2094_s1 + $0x428] sm:$0xff]  ;;  %v123_v57 = vld [vmem:[%s2094_s1 + $0x378] sm:$0xff]  ;;  %v1242_v60 = vpack.c.bf16 %v98_v54, %v74_v52  ;;  %v122_v1 = vld [vmem:[%s2094_s1 + $0x370] sm:$0xff] }
  0x2d   :  { %1207 = vmatpush1.bf16.msra.mxu1 %v1206_v58  ;;  %1193 = vmatprep.subr.bf16.mxu0 %v1192_v59  ;;  %v147_v58 = vld [vmem:[%s2094_s1 + $0x438] sm:$0xff]  ;;  %v1226_v59 = vpack.c.bf16 %v96_v51, %v72_v50  ;;  %v1228_v61 = vpack.c.bf16 %v145_v56, %v121_v55  ;;  %v146_v4 = vld [vmem:[%s2094_s1 + $0x430] sm:$0xff]  ;;  %v193_v6 = vld [vmem:[%s2094_s1 + $0x5a8] sm:$0xff] }
  0x2e   :  { %1209 = vmatprep.subr.bf16.mxu1 %v1208_v0  ;;  %580 = vmatprep.mubr.f32.mxu0 %v1317_v3  ;;  %v144_v0 = vld [vmem:[%s2094_s1 + $0x420] sm:$0xff]  ;;  %v1244_v2 = vpack.c.bf16 %v147_v58, %v123_v57  ;;  %v1246_v10 = vpack.c.bf16 %v146_v4, %v122_v1  ;;  %v1232_v11 = vpack.c.bf16 %v193_v6, %v169_v5  ;;  %v170_v15 = vld [vmem:[%s2094_s1 + $0x4f0] sm:$0xff]  ;;  %v53_v23 = vld [vmem:[%s2094_s1 + $0x148] sm:$0xff] }
  0x2f   :  { %651 = vmatprep.mubr.f32.mxu1 %v1317_v3  ;;  %v194_v16 = vld [vmem:[%s2094_s1 + $0x5b0] sm:$0xff]  ;;  %v216_v22 = vld [vmem:[%s2094_s1 + $0x660] sm:$0xff]  ;;  %v55_v25 = vld [vmem:[%s2094_s1 + $0x158] sm:$0xff] }
  0x30   :  { %1195 = vmatpush1.bf16.msra.mxu0 %v1194_v7  ;;  %v171_v7 = vld [vmem:[%s2094_s1 + $0x4f8] sm:$0xff]  ;;  %v1250_v18 = vpack.c.bf16 %v194_v16, %v170_v15  ;;  %v28_v26 = vld [vmem:[%s2094_s1 + $0x80] sm:$0xff]  ;;  %v101_v31 = vld [vmem:[%s2094_s1 + $0x2c8] sm:$0xff] }
  0x31   :  { %1211 = vmatpush1.bf16.msra.mxu1 %v1210_v8  ;;  %1197 = vmatprep.subr.bf16.mxu0 %v1196_v9  ;;  %v195_v8 = vld [vmem:[%s2094_s1 + $0x5b8] sm:$0xff]  ;;  %v1230_v9 = vpack.c.bf16 %v144_v0, %v120_v62  ;;  %v76_v40 = vld [vmem:[%s2094_s1 + $0x200] sm:$0xff]  ;;  %v102_v44 = vld [vmem:[%s2094_s1 + $0x2d0] sm:$0xff] }
  0x32   :  { %1213 = vmatprep.subr.bf16.mxu1 %v1212_v13  ;;  %v192_v13 = vld [vmem:[%s2094_s1 + $0x5a0] sm:$0xff]  ;;  %v1248_v14 = vpack.c.bf16 %v195_v8, %v171_v7  ;;  %v79_v34 = vld [vmem:[%s2094_s1 + $0x218] sm:$0xff]  ;;  %v125_v45 = vld [vmem:[%s2094_s1 + $0x388] sm:$0xff] }
  0x33   :  { %v1234_v17 = vpack.c.bf16 %v192_v13, %v168_v12  ;;  %v103_v35 = vld [vmem:[%s2094_s1 + $0x2d8] sm:$0xff]  ;;  %v100_v41 = vld [vmem:[%s2094_s1 + $0x2c0] sm:$0xff]  ;;  %v126_v54 = vld [vmem:[%s2094_s1 + $0x390] sm:$0xff] }
  0x34   :  { %1199 = vmatpush1.bf16.msra.mxu0 %v1198_v19  ;;  %v217_v19 = vld [vmem:[%s2094_s1 + $0x668] sm:$0xff]  ;;  %v124_v52 = vld [vmem:[%s2094_s1 + $0x380] sm:$0xff]  ;;  %v150_v56 = vld [vmem:[%s2094_s1 + $0x450] sm:$0xff] }
  0x35   :  { %1215 = vmatpush1.bf16.msra.mxu1 %v1214_v20  ;;  %1201 = vmatprep.subr.bf16.mxu0 %v1200_v21  ;;  %v219_v20 = vld [vmem:[%s2094_s1 + $0x678] sm:$0xff]  ;;  %v29_v21 = vld [vmem:[%s2094_s1 + $0x88] sm:$0xff]  ;;  %v1278_v62 = vpack.c.bf16 %v150_v56, %v126_v54  ;;  %v172_v1 = vld [vmem:[%s2094_s1 + $0x500] sm:$0xff] }
  0x36   :  { %1217 = vmatprep.subr.bf16.mxu1 %v1216_v24  ;;  %v31_v24 = vld [vmem:[%s2094_s1 + $0x98] sm:$0xff]  ;;  %v1252_v33 = vpack.c.bf16 %v53_v23, %v29_v21  ;;  %v173_v57 = vld [vmem:[%s2094_s1 + $0x508] sm:$0xff]  ;;  %v174_v5 = vld [vmem:[%s2094_s1 + $0x510] sm:$0xff] }
  0x37   :  { %v1268_v36 = vpack.c.bf16 %v55_v25, %v31_v24  ;;  %v197_v58 = vld [vmem:[%s2094_s1 + $0x5c8] sm:$0xff]  ;;  %v198_v6 = vld [vmem:[%s2094_s1 + $0x5d0] sm:$0xff]  ;;  %v220_v12 = vld [vmem:[%s2094_s1 + $0x680] sm:$0xff] }
  0x38   :  { %1203 = vmatpush1.bf16.msra.mxu0 %v1202_v27  ;;  %v52_v27 = vld [vmem:[%s2094_s1 + $0x140] sm:$0xff]  ;;  %v1264_v0 = vpack.c.bf16 %v197_v58, %v173_v57  ;;  %v1282_v8 = vpack.c.bf16 %v198_v6, %v174_v5  ;;  %v57_v13 = vld [vmem:[%s2094_s1 + $0x168] sm:$0xff]  ;;  %v59_v15 = vld [vmem:[%s2094_s1 + $0x178] sm:$0xff] }
  0x39   :  { %1219 = vmatpush1.bf16.msra.mxu1 %v1218_v28  ;;  %532 = vmatprep.subr.mxu0 %v213_v29  ;;  %v30_v28 = vld [vmem:[%s2094_s1 + $0x90] sm:$0xff]  ;;  %v1254_v37 = vpack.c.bf16 %v52_v27, %v28_v26  ;;  %v32_v16 = vld [vmem:[%s2094_s1 + $0xa0] sm:$0xff]  ;;  %v105_v21 = vld [vmem:[%s2094_s1 + $0x2e8] sm:$0xff] }
  0x3a   :  { %603 = vmatprep.subr.mxu1 %v215_v30  ;;  %v54_v29 = vld [vmem:[%s2094_s1 + $0x150] sm:$0xff]  ;;  %v77_v30 = vld [vmem:[%s2094_s1 + $0x208] sm:$0xff]  ;;  %v83_v24 = vld [vmem:[%s2094_s1 + $0x238] sm:$0xff] }
  0x3b   :  { %v1270_v38 = vpack.c.bf16 %v54_v29, %v30_v28  ;;  %v1256_v39 = vpack.c.bf16 %v101_v31, %v77_v30  ;;  %v107_v25 = vld [vmem:[%s2094_s1 + $0x2f8] sm:$0xff]  ;;  %v80_v30 = vld [vmem:[%s2094_s1 + $0x220] sm:$0xff]  ;;  %v202_v57 = vld [vmem:[%s2094_s1 + $0x5f0] sm:$0xff] }
  0x3c   :  { %533 = vmatpush1.msra.mxu0 %v212_v32  ;;  %v218_v32 = vld [vmem:[%s2094_s1 + $0x670] sm:$0xff]  ;;  %v104_v31 = vld [vmem:[%s2094_s1 + $0x2e0] sm:$0xff] }
  0x3d   :  { %604 = vmatpush1.msra.mxu1 %v214_v42  ;;  %1116 = vmatmul.mubr.msk.f32.vlgmr.msra.gmra.mrb[4].mxu0 %vm228_vm0, %v1476_v63  ;;  %v78_v42 = vld [vmem:[%s2094_s1 + $0x210] sm:$0xff]  ;;  %v176_v54 = vld [vmem:[%s2094_s1 + $0x520] sm:$0xff] }
  0x3e   :  { %1117 = vmatmul.mubr.msk.f32.vlgmr.msra.gmra.mrb[4].mxu1 %vm228_vm0, %v1476_v63  ;;  %1221 = vmatprep.subr.bf16.mxu0 %v1220_v43  ;;  %v1272_v43 = vpack.c.bf16 %v103_v35, %v79_v34  ;;  %v1274_v50 = vpack.c.bf16 %v102_v44, %v78_v42  ;;  %v106_v34 = vld [vmem:[%s2094_s1 + $0x2f0] sm:$0xff]  ;;  %v129_v35 = vld [vmem:[%s2094_s1 + $0x3a8] sm:$0xff]  ;;  %v128_v42 = vld [vmem:[%s2094_s1 + $0x3a0] sm:$0xff] }
  0x3f   :  { %1237 = vmatprep.subr.bf16.mxu1 %v1236_v46  ;;  %1223 = vmatpush1.bf16.msra.mxu0 %v1222_v47  ;;  %v149_v46 = vld [vmem:[%s2094_s1 + $0x448] sm:$0xff]  ;;  %v127_v47 = vld [vmem:[%s2094_s1 + $0x398] sm:$0xff]  ;;  %v130_v44 = vld [vmem:[%s2094_s1 + $0x3b0] sm:$0xff] }
  0x40   :  { %1239 = vmatpush1.bf16.msra.mxu1 %v1238_v48  ;;  %1225 = vmatprep.subr.bf16.mxu0 %v1224_v49  ;;  %v151_v48 = vld [vmem:[%s2094_s1 + $0x458] sm:$0xff]  ;;  %v1258_v49 = vpack.c.bf16 %v100_v41, %v76_v40  ;;  %v1260_v51 = vpack.c.bf16 %v149_v46, %v125_v45  ;;  %v154_v46 = vld [vmem:[%s2094_s1 + $0x470] sm:$0xff] }
  0x41   :  { %1241 = vmatprep.subr.bf16.mxu1 %v1240_v53  ;;  %722 = vmatprep.mubr.f32.mxu0 %v1317_v3  ;;  %v148_v53 = vld [vmem:[%s2094_s1 + $0x440] sm:$0xff]  ;;  %v1276_v55 = vpack.c.bf16 %v151_v48, %v127_v47  ;;  %v177_v47 = vld [vmem:[%s2094_s1 + $0x528] sm:$0xff] }
  0x42   :  { %793 = vmatprep.mubr.f32.mxu1 %v1317_v3  ;;  %v201_v48 = vld [vmem:[%s2094_s1 + $0x5e8] sm:$0xff] }
  0x43   :  { %1227 = vmatpush1.bf16.msra.mxu0 %v1226_v59  ;;  %v175_v59 = vld [vmem:[%s2094_s1 + $0x518] sm:$0xff] }
  0x44   :  { %1243 = vmatpush1.bf16.msra.mxu1 %v1242_v60  ;;  %1229 = vmatprep.subr.bf16.mxu0 %v1228_v61  ;;  %v199_v60 = vld [vmem:[%s2094_s1 + $0x5d8] sm:$0xff]  ;;  %v1262_v61 = vpack.c.bf16 %v148_v53, %v124_v52  ;;  %v1310_v52 = vpack.c.bf16 %v154_v46, %v130_v44  ;;  %v1296_v53 = vpack.c.bf16 %v201_v48, %v177_v47 }
  0x45   :  { %1245 = vmatprep.subr.bf16.mxu1 %v1244_v2  ;;  %v196_v2 = vld [vmem:[%s2094_s1 + $0x5c0] sm:$0xff]  ;;  %v1280_v4 = vpack.c.bf16 %v199_v60, %v175_v59  ;;  %v225_v60 = vld [vmem:[%s2094_s1 + $0x6a8] sm:$0xff] }
  0x46   :  { %v1266_v7 = vpack.c.bf16 %v196_v2, %v172_v1 }
  0x47   :  { %1231 = vmatpush1.bf16.msra.mxu0 %v1230_v9  ;;  %v221_v9 = vld [vmem:[%s2094_s1 + $0x688] sm:$0xff] }
  0x48   :  { %1247 = vmatpush1.bf16.msra.mxu1 %v1246_v10  ;;  %1233 = vmatprep.subr.bf16.mxu0 %v1232_v11  ;;  %v223_v10 = vld [vmem:[%s2094_s1 + $0x698] sm:$0xff]  ;;  %v33_v11 = vld [vmem:[%s2094_s1 + $0xa8] sm:$0xff] }
  0x49   :  { %1249 = vmatprep.subr.bf16.mxu1 %v1248_v14  ;;  %v35_v14 = vld [vmem:[%s2094_s1 + $0xb8] sm:$0xff]  ;;  %v1284_v23 = vpack.c.bf16 %v57_v13, %v33_v11 }
  0x4a   :  { %v1300_v26 = vpack.c.bf16 %v59_v15, %v35_v14 }
  0x4b   :  { %1235 = vmatpush1.bf16.msra.mxu0 %v1234_v17  ;;  %v56_v17 = vld [vmem:[%s2094_s1 + $0x160] sm:$0xff] }
  0x4c   :  { %1251 = vmatpush1.bf16.msra.mxu1 %v1250_v18  ;;  %674 = vmatprep.subr.mxu0 %v217_v19  ;;  %v34_v18 = vld [vmem:[%s2094_s1 + $0xb0] sm:$0xff]  ;;  %v1286_v27 = vpack.c.bf16 %v56_v17, %v32_v16 }
  0x4d   :  { %745 = vmatprep.subr.mxu1 %v219_v20  ;;  %v58_v19 = vld [vmem:[%s2094_s1 + $0x170] sm:$0xff]  ;;  %v81_v20 = vld [vmem:[%s2094_s1 + $0x228] sm:$0xff] }
  0x4e   :  { %v1302_v28 = vpack.c.bf16 %v58_v19, %v34_v18  ;;  %v1288_v29 = vpack.c.bf16 %v105_v21, %v81_v20 }
  0x4f   :  { %675 = vmatpush1.msra.mxu0 %v216_v22  ;;  %v222_v22 = vld [vmem:[%s2094_s1 + $0x690] sm:$0xff] }
  0x50   :  { %746 = vmatpush1.msra.mxu1 %v218_v32  ;;  %1118 = vmatmul.mubr.msk.f32.vlgmr.msra.gmra.mrb[6].mxu0 %vm228_vm0, %v1476_v63  ;;  %v82_v32 = vld [vmem:[%s2094_s1 + $0x230] sm:$0xff] }
  0x51   :  { %1119 = vmatmul.mubr.msk.f32.vlgmr.msra.gmra.mrb[6].mxu1 %vm228_vm0, %v1476_v63  ;;  %1253 = vmatprep.subr.bf16.mxu0 %v1252_v33  ;;  %v1304_v33 = vpack.c.bf16 %v107_v25, %v83_v24  ;;  %v1306_v40 = vpack.c.bf16 %v106_v34, %v82_v32 }
  0x52   :  { %1269 = vmatprep.subr.bf16.mxu1 %v1268_v36  ;;  %1255 = vmatpush1.bf16.msra.mxu0 %v1254_v37  ;;  %v153_v36 = vld [vmem:[%s2094_s1 + $0x468] sm:$0xff]  ;;  %v131_v37 = vld [vmem:[%s2094_s1 + $0x3b8] sm:$0xff] }
  0x53   :  { %1271 = vmatpush1.bf16.msra.mxu1 %v1270_v38  ;;  %1257 = vmatprep.subr.bf16.mxu0 %v1256_v39  ;;  %v155_v38 = vld [vmem:[%s2094_s1 + $0x478] sm:$0xff]  ;;  %v1290_v39 = vpack.c.bf16 %v104_v31, %v80_v30  ;;  %v1292_v41 = vpack.c.bf16 %v153_v36, %v129_v35 }
  0x54   :  { %1273 = vmatprep.subr.bf16.mxu1 %v1272_v43  ;;  %864 = vmatprep.mubr.f32.mxu0 %v1317_v3  ;;  %v152_v43 = vld [vmem:[%s2094_s1 + $0x460] sm:$0xff]  ;;  %v1308_v45 = vpack.c.bf16 %v155_v38, %v131_v37 }
  0x55   :  { %935 = vmatprep.mubr.f32.mxu1 %v1317_v3 }
  0x56   :  { %1259 = vmatpush1.bf16.msra.mxu0 %v1258_v49  ;;  %v179_v49 = vld [vmem:[%s2094_s1 + $0x538] sm:$0xff] }
  0x57   :  { %1275 = vmatpush1.bf16.msra.mxu1 %v1274_v50  ;;  %1261 = vmatprep.subr.bf16.mxu0 %v1260_v51  ;;  %v203_v50 = vld [vmem:[%s2094_s1 + $0x5f8] sm:$0xff]  ;;  %v1294_v51 = vpack.c.bf16 %v152_v43, %v128_v42 }
  0x58   :  { %1277 = vmatprep.subr.bf16.mxu1 %v1276_v55  ;;  %v200_v55 = vld [vmem:[%s2094_s1 + $0x5e0] sm:$0xff]  ;;  %v1312_v56 = vpack.c.bf16 %v203_v50, %v179_v49 }
  0x59   :  { %v1298_v58 = vpack.c.bf16 %v200_v55, %v176_v54 }
  0x5a   :  { %1263 = vmatpush1.bf16.msra.mxu0 %v1262_v61  ;;  %v227_v61 = vld [vmem:[%s2094_s1 + $0x6b8] sm:$0xff] }
  0x5b   :  { %1279 = vmatpush1.bf16.msra.mxu1 %v1278_v62  ;;  %1265 = vmatprep.subr.bf16.mxu0 %v1264_v0  ;;  %v224_v62 = vld [vmem:[%s2094_s1 + $0x6a0] sm:$0xff]  ;;  %v226_v0 = vld [vmem:[%s2094_s1 + $0x6b0] sm:$0xff] }
  0x5c   :  { %1281 = vmatprep.subr.bf16.mxu1 %v1280_v4 }
  0x5e   :  { %1267 = vmatpush1.bf16.msra.mxu0 %v1266_v7 }
  0x5f   :  { %1283 = vmatpush1.bf16.msra.mxu1 %v1282_v8  ;;  %816 = vmatprep.subr.mxu0 %v221_v9 }
  0x60   :  { %887 = vmatprep.subr.mxu1 %v223_v10 }
  0x62   :  { %817 = vmatpush1.msra.mxu0 %v220_v12 }
  0x63   :  { %888 = vmatpush1.msra.mxu1 %v222_v22  ;;  %1120 = vmatmul.mubr.msk.f32.vlgmr.msra.gmra.mrb[8].mxu0 %vm228_vm0, %v1476_v63 }
  0x64   :  { %1121 = vmatmul.mubr.msk.f32.vlgmr.msra.gmra.mrb[8].mxu1 %vm228_vm0, %v1476_v63  ;;  %1285 = vmatprep.subr.bf16.mxu0 %v1284_v23 }
  0x65   :  { %1301 = vmatprep.subr.bf16.mxu1 %v1300_v26  ;;  %1287 = vmatpush1.bf16.msra.mxu0 %v1286_v27 }
  0x66   :  { %1303 = vmatpush1.bf16.msra.mxu1 %v1302_v28  ;;  %1289 = vmatprep.subr.bf16.mxu0 %v1288_v29 }
  0x67   :  { %1305 = vmatprep.subr.bf16.mxu1 %v1304_v33  ;;  %1006 = vmatprep.mubr.f32.mxu0 %v1317_v3 }
  0x68   :  { %1077 = vmatprep.mubr.f32.mxu1 %v1317_v3  ;;  %v178_v3 = vld [vmem:[%s2094_s1 + $0x530] sm:$0xff] }
  0x69   :  { %1291 = vmatpush1.bf16.msra.mxu0 %v1290_v39  ;;  %v1314_v59 = vpack.c.bf16 %v202_v57, %v178_v3 }
  0x6a   :  { %1307 = vmatpush1.bf16.msra.mxu1 %v1306_v40  ;;  %1293 = vmatprep.subr.bf16.mxu0 %v1292_v41 }
  0x6b   :  { %1309 = vmatprep.subr.bf16.mxu1 %v1308_v45 }
  0x6d   :  { %1295 = vmatpush1.bf16.msra.mxu0 %v1294_v51 }
  0x6e   :  { %1311 = vmatpush1.bf16.msra.mxu1 %v1310_v52  ;;  %1297 = vmatprep.subr.bf16.mxu0 %v1296_v53 }
  0x6f   :  { %1313 = vmatprep.subr.bf16.mxu1 %v1312_v56 }
  0x71   :  { %1299 = vmatpush1.bf16.msra.mxu0 %v1298_v58 }
  0x72   :  { %1315 = vmatpush1.bf16.msra.mxu1 %v1314_v59  ;;  %958 = vmatprep.subr.mxu0 %v225_v60 }
  0x73   :  { %1029 = vmatprep.subr.mxu1 %v227_v61 }
  0x75   :  { %959 = vmatpush1.msra.mxu0 %v224_v62 }
  0x76   :  { %1030 = vmatpush1.msra.mxu1 %v226_v0  ;;  %1122 = vmatmul.mubr.msk.f32.vlgmr.msra.gmra.mrb[10].mxu0 %vm228_vm0, %v1476_v63 }
  0x77   :  { %1123 = vmatmul.mubr.msk.f32.vlgmr.msra.gmra.mrb[10].mxu1 %vm228_vm0, %v1476_v63 }
  0xea   :  { %v298_v1 = vpop.f32.mrb[0].mxu0 }
  0xeb   :  { %1084 = vst [vmem:[%s2096_s2] sm:$0xff] %v298_v1  ;;  %v369_v2 = vpop.f32.mrb[0].mxu1  ;;  %v300_v4 = vpop.f32.mrb[1].mxu0 }
  0xec   :  { %1086 = vst [vmem:[%s2096_s2 + $0x10] sm:$0xff] %v369_v2  ;;  %1085 = vst [vmem:[%s2096_s2 + $0x8] sm:$0xff] %v300_v4  ;;  %v371_v5 = vpop.f32.mrb[1].mxu1 }
  0xed   :  { %1087 = vst [vmem:[%s2096_s2 + $0x18] sm:$0xff] %v371_v5 }
  0xfd   :  { %v440_v63 = vpop.f32.mrb[2].mxu0 }
  0xfe   :  { %1088 = vst [vmem:[%s2096_s2 + $0x20] sm:$0xff] %v440_v63  ;;  %v511_v6 = vpop.f32.mrb[2].mxu1  ;;  %v442_v7 = vpop.f32.mrb[3].mxu0 }
  0xff   :  { %1090 = vst [vmem:[%s2096_s2 + $0x30] sm:$0xff] %v511_v6  ;;  %1089 = vst [vmem:[%s2096_s2 + $0x28] sm:$0xff] %v442_v7  ;;  %v513_v8 = vpop.f32.mrb[3].mxu1 }
 0x100   :  { %1091 = vst [vmem:[%s2096_s2 + $0x38] sm:$0xff] %v513_v8 }
 0x110   :  { %v582_v9 = vpop.f32.mrb[4].mxu0 }
 0x111   :  { %1092 = vst [vmem:[%s2096_s2 + $0x40] sm:$0xff] %v582_v9  ;;  %v653_v10 = vpop.f32.mrb[4].mxu1  ;;  %v584_v11 = vpop.f32.mrb[5].mxu0 }
 0x112   :  { %1094 = vst [vmem:[%s2096_s2 + $0x50] sm:$0xff] %v653_v10  ;;  %1093 = vst [vmem:[%s2096_s2 + $0x48] sm:$0xff] %v584_v11  ;;  %v655_v12 = vpop.f32.mrb[5].mxu1 }
 0x113   :  { %1095 = vst [vmem:[%s2096_s2 + $0x58] sm:$0xff] %v655_v12 }
 0x123   :  { %v724_v13 = vpop.f32.mrb[6].mxu0 }
 0x124   :  { %1096 = vst [vmem:[%s2096_s2 + $0x60] sm:$0xff] %v724_v13  ;;  %v795_v14 = vpop.f32.mrb[6].mxu1  ;;  %v726_v15 = vpop.f32.mrb[7].mxu0 }
 0x125   :  { %1098 = vst [vmem:[%s2096_s2 + $0x70] sm:$0xff] %v795_v14  ;;  %1097 = vst [vmem:[%s2096_s2 + $0x68] sm:$0xff] %v726_v15  ;;  %v797_v16 = vpop.f32.mrb[7].mxu1 }
 0x126   :  { %1099 = vst [vmem:[%s2096_s2 + $0x78] sm:$0xff] %v797_v16 }
 0x136   :  { %v866_v17 = vpop.f32.mrb[8].mxu0 }
 0x137   :  { %1100 = vst [vmem:[%s2096_s2 + $0x80] sm:$0xff] %v866_v17  ;;  %v937_v18 = vpop.f32.mrb[8].mxu1  ;;  %v868_v19 = vpop.f32.mrb[9].mxu0 }
 0x138   :  { %1102 = vst [vmem:[%s2096_s2 + $0x90] sm:$0xff] %v937_v18  ;;  %1101 = vst [vmem:[%s2096_s2 + $0x88] sm:$0xff] %v868_v19  ;;  %v939_v20 = vpop.f32.mrb[9].mxu1 }
 0x139   :  { %1103 = vst [vmem:[%s2096_s2 + $0x98] sm:$0xff] %v939_v20 }
 0x149   :  { %v1008_v21 = vpop.f32.mrb[10].mxu0 }
 0x14a   :  { %1104 = vst [vmem:[%s2096_s2 + $0xa0] sm:$0xff] %v1008_v21  ;;  %v1079_v22 = vpop.f32.mrb[10].mxu1  ;;  %v1010_v23 = vpop.f32.mrb[11].mxu0 }
 0x14b   :  { %1106 = vst [vmem:[%s2096_s2 + $0xb0] sm:$0xff] %v1079_v22  ;;  %1105 = vst [vmem:[%s2096_s2 + $0xa8] sm:$0xff] %v1010_v23  ;;  %v1081_v24 = vpop.f32.mrb[11].mxu1 }
 0x14c   :  { %1107 = vst [vmem:[%s2096_s2 + $0xb8] sm:$0xff] %v1081_v24 }

</bundles_post_ra>
